<compile_context>
chip_gen: v6e
topology: v6e:2x2x1
jax: 0.10.0
libtpu: 0.0.40
codegen_flags: <defaults>
</compile_context>

<pallas_src>
import functools

import jax
import jax.numpy as jnp
from jax.experimental import pallas as pl
from jax.experimental.pallas import tpu as pltpu

# masked_fill_(-inf) stand-in: exp underflows to exactly 0 for every non-fully-
# padded row.  Plain Python float -> jaxpr literal, NOT a captured constant.
_NEG_INF = -1e30


def _softmax(x, axis):
    """Numerically stable softmax; divide replaced by EUP reciprocal-multiply."""
    m = jnp.max(x, axis=axis, keepdims=True)
    e = jnp.exp(x - m)
    s = jnp.sum(e, axis=axis, keepdims=True)
    return e * pl.reciprocal(s, approx=False)


def _reattention_kernel(gam_ref, d_ref, q_ref, qmask_ref, dmask_ref,
                        ea_ref, ba_ref, w_ref, b_ref, offdiag_ref,
                        et_ref, bt_out_ref, ah_ref, *, matmul_dtype):
    e_gamma = gam_ref[0]                      # SMEM scalars
    b_gamma = gam_ref[1]

    d_emb = d_ref[...]                        # (bt, Ld, D)
    q_emb = q_ref[...]                        # (bt, Lq, D)
    ea = ea_ref[...]                          # (bt, Ld, Lq)
    ba = ba_ref[...]                          # (bt, Ld, Ld)
    w = w_ref[...].astype(matmul_dtype)       # (D, D)   VMEM-resident
    bias = b_ref[...]                         # (1, D)   VMEM-resident
    q_pad = qmask_ref[...] != 0               # (bt, 1, Lq)  True where padding
    d_pad = dmask_ref[...] != 0               # (bt, 1, Ld)
    off_diag = offdiag_ref[...]               # (Ld, Ld) == 1 - eye(Ld), resident

    bt, ld, dim = d_emb.shape
    lq = q_emb.shape[1]
    f32 = jnp.float32
    cast = lambda x: x.astype(matmul_dtype)

    # ---- re-attention priors from the previous layer's logits ----------------
    # softmax(e_a^T,2).bmm(softmax(b_a^T,1)).T == row_softmax(b_a) @ col_softmax(e_a)
    # softmax(b_a^T,2).bmm(softmax(b_a^T,1)).T == row_softmax(b_a) @ col_softmax(b_a)
    ba_row = _softmax(ba, axis=-1)
    ba_col = _softmax(ba, axis=-2)
    ea_col = _softmax(ea, axis=-2)
    e_tt = jnp.einsum('bij,bjk->bik', cast(ba_row), cast(ea_col),
                      preferred_element_type=f32)             # (bt, Ld, Lq)
    b_tt = jnp.einsum('bij,bjk->bik', cast(ba_row), cast(ba_col),
                      preferred_element_type=f32)             # (bt, Ld, Ld)

    # ---- shared linear projection: ONE MXU matmul over bt*(Ld+Lq) rows --------
    dq_flat = jnp.concatenate(
        [d_emb.reshape(bt * ld, dim), q_emb.reshape(bt * lq, dim)], axis=0)
    dq_proj = jnp.dot(cast(dq_flat), w, preferred_element_type=f32) + bias
    dq_proj = jnp.maximum(dq_proj, 0.0)                       # relu
    d_proj = dq_proj[:bt * ld].reshape(bt, ld, dim)
    q_proj = dq_proj[bt * ld:].reshape(bt, lq, dim)

    # ---- E branch -------------------------------------------------------------
    scores_e = jnp.einsum('bid,bjd->bij', cast(d_proj), cast(q_proj),
                          preferred_element_type=f32)         # (bt, Ld, Lq)
    scores_e = jnp.where(q_pad, _NEG_INF, scores_e)
    e_f = _softmax(scores_e, axis=-1)
    et_ref[...] = (e_f + e_gamma * e_tt).astype(et_ref.dtype)
    h_t = jnp.einsum('bij,bjd->bid', cast(e_f), cast(q_emb),
                     preferred_element_type=f32)              # (bt, Ld, D)

    # ---- B branch -------------------------------------------------------------
    h_proj = jnp.dot(cast(h_t.reshape(bt * ld, dim)), w,
                     preferred_element_type=f32) + bias
    h_proj = jnp.maximum(h_proj, 0.0).reshape(bt, ld, dim)
    scores_b = jnp.einsum('bid,bjd->bij', cast(h_proj), cast(h_proj),
                          preferred_element_type=f32)         # (bt, Ld, Ld)
    scores_b = jnp.where(d_pad, _NEG_INF, scores_b)
    b_f = _softmax(scores_b, axis=-1)
    b_t = (b_f + b_gamma * b_tt) * off_diag                   # zero the diagonal
    bt_out_ref[...] = b_t.astype(bt_out_ref.dtype)
    ah_ref[...] = jnp.einsum('bij,bjd->bid', cast(b_t), cast(h_t),
                             preferred_element_type=f32).astype(ah_ref.dtype)


def reattention_layer(q_embedding, d_embedding, q_mask, d_mask,
                      e_alpha, b_alpha, e_gamma, b_gamma, w, bias,
                      *, block_batch=8, matmul_dtype=jnp.float32):
    """ReattentionLayer forward.

    q_embedding: (B, Lq, D)   d_embedding: (B, Ld, D)
    q_mask:      (B, Lq)      d_mask:      (B, Ld)   (1 = padding, 0 = real token)
    e_alpha:     (B, Ld, Lq)  b_alpha:     (B, Ld, Ld)
    w:           (D, D) input-major (PyTorch nn.Linear weight transposed)
    bias:        (D,)
    Returns (E_t, B_t, align_ht) in float32.
    """
    f32 = jnp.float32
    B, Lq, D = q_embedding.shape
    Ld = d_embedding.shape[1]

    # Batch blocking: bt batch elements per grid step; keep >= 2 grid steps when
    # B >= 2 so v7x's two TensorCores both get work under "parallel" semantics.
    # Re-derive block_batch per chip generation / production Ld: the (bt,Ld,Ld)
    # b_alpha / B_t slabs dominate the double-buffered VMEM footprint
    # (16 MiB scoped default on v5e, 32 MiB on v6e/v7x).
    bt = max(1, min(int(block_batch), pl.cdiv(B, 2))) if B >= 2 else 1
    n_steps = pl.cdiv(B, bt)
    B_pad = n_steps * bt

    def pad_batch(x):
        if B_pad == B:
            return x
        return jnp.pad(x, [(0, B_pad - B)] + [(0, 0)] * (x.ndim - 1))

    d_emb = pad_batch(d_embedding.astype(f32))
    q_emb = pad_batch(q_embedding.astype(f32))
    qm = pad_batch(q_mask.astype(jnp.int32).reshape(B, 1, Lq))
    dm = pad_batch(d_mask.astype(jnp.int32).reshape(B, 1, Ld))
    ea = pad_batch(e_alpha.astype(f32))
    ba = pad_batch(b_alpha.astype(f32))

    gammas = jnp.stack([jnp.asarray(e_gamma, f32), jnp.asarray(b_gamma, f32)])
    bias2 = bias.astype(f32).reshape(1, D)
    off_diag = 1.0 - jnp.eye(Ld, dtype=f32)        # resident (1 - I) mask

    kernel = functools.partial(_reattention_kernel, matmul_dtype=matmul_dtype)

    out_shape = (
        jax.ShapeDtypeStruct((B_pad, Ld, Lq), f32),   # E_t
        jax.ShapeDtypeStruct((B_pad, Ld, Ld), f32),   # B_t
        jax.ShapeDtypeStruct((B_pad, Ld, D), f32),    # align_ht
    )

    grid_spec = pltpu.PrefetchScalarGridSpec(
        num_scalar_prefetch=0,
        grid=(n_steps,),
        in_specs=[
            pl.BlockSpec(memory_space=pltpu.MemorySpace.SMEM),  # gammas (2,)
            pl.BlockSpec((bt, Ld, D), lambda i: (i, 0, 0)),     # d_embedding
            pl.BlockSpec((bt, Lq, D), lambda i: (i, 0, 0)),     # q_embedding
            pl.BlockSpec((bt, 1, Lq), lambda i: (i, 0, 0)),     # q_mask
            pl.BlockSpec((bt, 1, Ld), lambda i: (i, 0, 0)),     # d_mask
            pl.BlockSpec((bt, Ld, Lq), lambda i: (i, 0, 0)),    # e_alpha
            pl.BlockSpec((bt, Ld, Ld), lambda i: (i, 0, 0)),    # b_alpha
            pl.BlockSpec((D, D), lambda i: (0, 0)),             # W     (resident)
            pl.BlockSpec((1, D), lambda i: (0, 0)),             # bias  (resident)
            pl.BlockSpec((Ld, Ld), lambda i: (0, 0)),           # 1-eye (resident)
        ],
        out_specs=[
            pl.BlockSpec((bt, Ld, Lq), lambda i: (i, 0, 0)),    # E_t
            pl.BlockSpec((bt, Ld, Ld), lambda i: (i, 0, 0)),    # B_t
            pl.BlockSpec((bt, Ld, D), lambda i: (i, 0, 0)),     # align_ht
        ],
    )

    e_t, b_t, align_ht = pl.pallas_call(
        kernel,
        out_shape=out_shape,
        grid_spec=grid_spec,
        compiler_params=pltpu.CompilerParams(
            dimension_semantics=("parallel",)),
    )(gammas, d_emb, q_emb, qm, dm, ea, ba, w.astype(f32), bias2, off_diag)

    if B_pad != B:
        e_t, b_t, align_ht = e_t[:B], b_t[:B], align_ht[:B]
    return e_t, b_t, align_ht


def reference(q_embedding, d_embedding, q_mask, d_mask,
              e_alpha, b_alpha, e_gamma, b_gamma, w, bias):
    """Pure-JAX transcription of the PyTorch forward."""
    ld = d_embedding.shape[1]
    ea_t = jnp.swapaxes(e_alpha, 1, 2)                     # (B, Lq, Ld)
    ba_t = jnp.swapaxes(b_alpha, 1, 2)                     # (B, Ld, Ld)
    e_tt = jnp.swapaxes(
        jnp.matmul(jax.nn.softmax(ea_t, axis=2), jax.nn.softmax(ba_t, axis=1)),
        1, 2)                                              # (B, Ld, Lq)
    d_proj = jax.nn.relu(d_embedding @ w + bias)
    q_proj = jax.nn.relu(q_embedding @ w + bias)
    scores = jnp.matmul(d_proj, jnp.swapaxes(q_proj, 1, 2))
    scores = jnp.where(q_mask[:, None, :] != 0, -1e30, scores)
    e_f = jax.nn.softmax(scores, axis=-1)
    e_t = e_f + e_gamma * e_tt
    h_t = jnp.matmul(e_f, q_embedding)                     # (B, Ld, D)
    b_tt = jnp.swapaxes(
        jnp.matmul(jax.nn.softmax(ba_t, axis=2), jax.nn.softmax(ba_t, axis=1)),
        1, 2)                                              # (B, Ld, Ld)
    h_proj = jax.nn.relu(h_t @ w + bias)
    scores_b = jnp.matmul(h_proj, jnp.swapaxes(h_proj, 1, 2))
    scores_b = jnp.where(d_mask[:, None, :] != 0, -1e30, scores_b)
    b_f = jax.nn.softmax(scores_b, axis=-1)
    b_t = (b_f + b_gamma * b_tt) * (1.0 - jnp.eye(ld))[None]
    align_ht = jnp.matmul(b_t, h_t)
    return e_t, b_t, align_ht


if __name__ == "__main__":
    batch, max_q, max_d, hidden = 8, 8, 16, 128

    key = jax.random.PRNGKey(0)
    kq, kd, kea, kba, kw, kb = jax.random.split(key, 6)

    q_embedding = jax.random.normal(kq, (batch, max_q, hidden), jnp.float32)
    d_embedding = jax.random.normal(kd, (batch, max_d, hidden), jnp.float32)
    e_alpha = jax.random.normal(kea, (batch, max_d, max_q), jnp.float32)
    b_alpha = jax.random.normal(kba, (batch, max_d, max_d), jnp.float32)

    # Padding masks (1 = padding, 0 = real token); every row keeps real tokens.
    q_len = jnp.array([8, 6, 7, 5, 8, 4, 6, 3])
    d_len = jnp.array([16, 12, 9, 16, 10, 14, 16, 7])
    q_mask = (jnp.arange(max_q)[None, :] >= q_len[:, None]).astype(jnp.int32)
    d_mask = (jnp.arange(max_d)[None, :] >= d_len[:, None]).astype(jnp.int32)

    # Shared nn.Linear parameters (input-major weight = PyTorch weight^T).
    scale = hidden ** -0.5
    w = jax.random.uniform(kw, (hidden, hidden), jnp.float32, -scale, scale)
    bias = jax.random.uniform(kb, (hidden,), jnp.float32, -scale, scale)

    e_gamma, b_gamma = 0.5, 0.3

    e_t, b_t, align_ht = reattention_layer(
        q_embedding, d_embedding, q_mask, d_mask,
        e_alpha, b_alpha, e_gamma, b_gamma, w, bias,
        block_batch=8, matmul_dtype=jnp.float32)
    jax.block_until_ready((e_t, b_t, align_ht))

    e_t_ref, b_t_ref, align_ht_ref = reference(
        q_embedding, d_embedding, q_mask, d_mask,
        e_alpha, b_alpha, e_gamma, b_gamma, w, bias)

    assert e_t.shape == (batch, max_d, max_q)
    assert b_t.shape == (batch, max_d, max_d)
    assert align_ht.shape == (batch, max_d, hidden)
    assert jnp.allclose(e_t, e_t_ref, atol=1e-4, rtol=1e-4)
    assert jnp.allclose(b_t, b_t_ref, atol=1e-4, rtol=1e-4)
    assert jnp.allclose(align_ht, align_ht_ref, atol=1e-4, rtol=1e-4)

    print("KERNEL_OK")
</pallas_src>

<mosaic_0001>
module attributes {stable_mosaic.version = 11 : i64} {
  func.func @_reattention_kernel(%arg0: i32, %arg1: memref<2xf32, #tpu.memory_space<smem>>, %arg2: memref<4x16x128xf32, #tpu.memory_space<vmem>>, %arg3: memref<4x8x128xf32, #tpu.memory_space<vmem>>, %arg4: memref<4x1x8xi32, #tpu.memory_space<vmem>>, %arg5: memref<4x1x16xi32, #tpu.memory_space<vmem>>, %arg6: memref<4x16x8xf32, #tpu.memory_space<vmem>>, %arg7: memref<4x16x16xf32, #tpu.memory_space<vmem>>, %arg8: memref<128x128xf32, #tpu.memory_space<vmem>>, %arg9: memref<1x128xf32, #tpu.memory_space<vmem>>, %arg10: memref<16x16xf32, #tpu.memory_space<vmem>>, %arg11: memref<4x16x8xf32, #tpu.memory_space<vmem>>, %arg12: memref<4x16x16xf32, #tpu.memory_space<vmem>>, %arg13: memref<4x16x128xf32, #tpu.memory_space<vmem>>) attributes {dimension_semantics = [#tpu.dimension_semantics<parallel>], iteration_bounds = array<i64: 2>, scalar_prefetch = 0 : i64, scratch_operands = 0 : i64, tpu.core_type = #tpu.core_type<tc>, window_params = [{transform_indices = @transform_0, window_bounds = array<i64: 2>}, {transform_indices = @transform_1, window_bounds = array<i64: 4, 16, 128>}, {transform_indices = @transform_2, window_bounds = array<i64: 4, 8, 128>}, {transform_indices = @transform_3, window_bounds = array<i64: 4, 1, 8>}, {transform_indices = @transform_4, window_bounds = array<i64: 4, 1, 16>}, {transform_indices = @transform_5, window_bounds = array<i64: 4, 16, 8>}, {transform_indices = @transform_6, window_bounds = array<i64: 4, 16, 16>}, {pipeline_mode = #tpu.pipeline_mode<synchronous>, transform_indices = @transform_7, window_bounds = array<i64: 128, 128>}, {pipeline_mode = #tpu.pipeline_mode<synchronous>, transform_indices = @transform_8, window_bounds = array<i64: 1, 128>}, {pipeline_mode = #tpu.pipeline_mode<synchronous>, transform_indices = @transform_9, window_bounds = array<i64: 16, 16>}, {transform_indices = @transform_10, window_bounds = array<i64: 4, 16, 8>}, {transform_indices = @transform_11, window_bounds = array<i64: 4, 16, 16>}, {transform_indices = @transform_12, window_bounds = array<i64: 4, 16, 128>}]} {
    %c0 = arith.constant 0 : index
    %0 = memref.load %arg1[%c0] : memref<2xf32, #tpu.memory_space<smem>>
    %c1 = arith.constant 1 : index
    %1 = memref.load %arg1[%c1] : memref<2xf32, #tpu.memory_space<smem>>
    %c0_0 = arith.constant 0 : index
    %c0_1 = arith.constant 0 : index
    %c0_2 = arith.constant 0 : index
    %2 = vector.load %arg2[%c0_0, %c0_1, %c0_2] : memref<4x16x128xf32, #tpu.memory_space<vmem>>, vector<4x16x128xf32>
    %c0_3 = arith.constant 0 : index
    %c0_4 = arith.constant 0 : index
    %c0_5 = arith.constant 0 : index
    %3 = vector.load %arg3[%c0_3, %c0_4, %c0_5] : memref<4x8x128xf32, #tpu.memory_space<vmem>>, vector<4x8x128xf32>
    %c0_6 = arith.constant 0 : index
    %c0_7 = arith.constant 0 : index
    %c0_8 = arith.constant 0 : index
    %4 = vector.load %arg6[%c0_6, %c0_7, %c0_8] : memref<4x16x8xf32, #tpu.memory_space<vmem>>, vector<4x16x8xf32>
    %c0_9 = arith.constant 0 : index
    %c0_10 = arith.constant 0 : index
    %c0_11 = arith.constant 0 : index
    %5 = vector.load %arg7[%c0_9, %c0_10, %c0_11] : memref<4x16x16xf32, #tpu.memory_space<vmem>>, vector<4x16x16xf32>
    %c0_12 = arith.constant 0 : index
    %c0_13 = arith.constant 0 : index
    %6 = vector.load %arg8[%c0_12, %c0_13] : memref<128x128xf32, #tpu.memory_space<vmem>>, vector<128x128xf32>
    %c0_14 = arith.constant 0 : index
    %c0_15 = arith.constant 0 : index
    %7 = vector.load %arg9[%c0_14, %c0_15] : memref<1x128xf32, #tpu.memory_space<vmem>>, vector<1x128xf32>
    %c0_16 = arith.constant 0 : index
    %c0_17 = arith.constant 0 : index
    %c0_18 = arith.constant 0 : index
    %8 = vector.load %arg4[%c0_16, %c0_17, %c0_18] : memref<4x1x8xi32, #tpu.memory_space<vmem>>, vector<4x1x8xi32>
    %c0_i32 = arith.constant 0 : i32
    %9 = vector.broadcast %c0_i32 : i32 to vector<4x1x8xi32>
    %10 = arith.cmpi ne, %8, %9 : vector<4x1x8xi32>
    %c0_19 = arith.constant 0 : index
    %c0_20 = arith.constant 0 : index
    %c0_21 = arith.constant 0 : index
    %11 = vector.load %arg5[%c0_19, %c0_20, %c0_21] : memref<4x1x16xi32, #tpu.memory_space<vmem>>, vector<4x1x16xi32>
    %c0_i32_22 = arith.constant 0 : i32
    %12 = vector.broadcast %c0_i32_22 : i32 to vector<4x1x16xi32>
    %13 = arith.cmpi ne, %11, %12 : vector<4x1x16xi32>
    %c0_23 = arith.constant 0 : index
    %c0_24 = arith.constant 0 : index
    %14 = vector.load %arg10[%c0_23, %c0_24] : memref<16x16xf32, #tpu.memory_space<vmem>>, vector<16x16xf32>
    %cst = arith.constant dense<0xFF800000> : vector<4x16xf32>
    %15 = vector.multi_reduction <maximumf>, %5, %cst [2] : vector<4x16x16xf32> to vector<4x16xf32>
    %16 = vector.shape_cast %15 : vector<4x16xf32> to vector<4x16x1xf32>
    %17 = vector.broadcast %16 : vector<4x16x1xf32> to vector<4x16x16xf32>
    %18 = arith.subf %5, %17 : vector<4x16x16xf32>
    %19 = math.exp %18 : vector<4x16x16xf32>
    %cst_25 = arith.constant dense<0.000000e+00> : vector<4x16xf32>
    %20 = vector.multi_reduction <add>, %19, %cst_25 [2] : vector<4x16x16xf32> to vector<4x16xf32>
    %21 = vector.shape_cast %20 : vector<4x16xf32> to vector<4x16x1xf32>
    %22 = tpu.reciprocal %21 : vector<4x16x1xf32> -> vector<4x16x1xf32>
    %23 = vector.broadcast %22 : vector<4x16x1xf32> to vector<4x16x16xf32>
    %24 = arith.mulf %19, %23 : vector<4x16x16xf32>
    %cst_26 = arith.constant dense<0xFF800000> : vector<4x16xf32>
    %25 = vector.multi_reduction <maximumf>, %5, %cst_26 [1] : vector<4x16x16xf32> to vector<4x16xf32>
    %26 = vector.shape_cast %25 : vector<4x16xf32> to vector<4x1x16xf32>
    %27 = vector.broadcast %26 : vector<4x1x16xf32> to vector<4x16x16xf32>
    %28 = arith.subf %5, %27 : vector<4x16x16xf32>
    %29 = math.exp %28 : vector<4x16x16xf32>
    %cst_27 = arith.constant dense<0.000000e+00> : vector<4x16xf32>
    %30 = vector.multi_reduction <add>, %29, %cst_27 [1] : vector<4x16x16xf32> to vector<4x16xf32>
    %31 = vector.shape_cast %30 : vector<4x16xf32> to vector<4x1x16xf32>
    %32 = tpu.reciprocal %31 : vector<4x1x16xf32> -> vector<4x1x16xf32>
    %33 = vector.broadcast %32 : vector<4x1x16xf32> to vector<4x16x16xf32>
    %34 = arith.mulf %29, %33 : vector<4x16x16xf32>
    %cst_28 = arith.constant dense<0xFF800000> : vector<4x8xf32>
    %35 = vector.multi_reduction <maximumf>, %4, %cst_28 [1] : vector<4x16x8xf32> to vector<4x8xf32>
    %36 = vector.shape_cast %35 : vector<4x8xf32> to vector<4x1x8xf32>
    %37 = vector.broadcast %36 : vector<4x1x8xf32> to vector<4x16x8xf32>
    %38 = arith.subf %4, %37 : vector<4x16x8xf32>
    %39 = math.exp %38 : vector<4x16x8xf32>
    %cst_29 = arith.constant dense<0.000000e+00> : vector<4x8xf32>
    %40 = vector.multi_reduction <add>, %39, %cst_29 [1] : vector<4x16x8xf32> to vector<4x8xf32>
    %41 = vector.shape_cast %40 : vector<4x8xf32> to vector<4x1x8xf32>
    %42 = tpu.reciprocal %41 : vector<4x1x8xf32> -> vector<4x1x8xf32>
    %43 = vector.broadcast %42 : vector<4x1x8xf32> to vector<4x16x8xf32>
    %44 = arith.mulf %39, %43 : vector<4x16x8xf32>
    "tpu.trace_start"() <{level = 10 : i32, message = "bij,bjk->bik"}> : () -> ()
    %cst_30 = arith.constant dense<0.000000e+00> : vector<4x16x8xf32>
    %45 = tpu.matmul %24, %44, %cst_30 {dimension_numbers = #tpu.dot_dimension_numbers<[2], [1], [1], [2], [0, 0, 0, 1, 1, 2], [0], [0]>} : vector<4x16x16xf32>, vector<4x16x8xf32>, vector<4x16x8xf32> -> vector<4x16x8xf32>
    %cst_31 = arith.constant dense<0.000000e+00> : vector<4x16x16xf32>
    %46 = tpu.matmul %24, %34, %cst_31 {dimension_numbers = #tpu.dot_dimension_numbers<[2], [1], [1], [2], [0, 0, 0, 1, 1, 2], [0], [0]>} : vector<4x16x16xf32>, vector<4x16x16xf32>, vector<4x16x16xf32> -> vector<4x16x16xf32>
    "tpu.trace_stop"() : () -> ()
    %47 = vector.shape_cast %2 : vector<4x16x128xf32> to vector<64x128xf32>
    %48 = vector.shape_cast %3 : vector<4x8x128xf32> to vector<32x128xf32>
    %49 = tpu.concatenate %47, %48 in 0 : vector<64x128xf32>, vector<32x128xf32> -> vector<96x128xf32>
    %cst_32 = arith.constant dense<0.000000e+00> : vector<96x128xf32>
    %50 = tpu.matmul %49, %6, %cst_32 {dimension_numbers = #tpu.dot_dimension_numbers<[1], [0], [0], [1], [0, 0, 1, 1], [], []>} : vector<96x128xf32>, vector<128x128xf32>, vector<96x128xf32> -> vector<96x128xf32>
    %51 = vector.broadcast %7 : vector<1x128xf32> to vector<96x128xf32>
    %52 = arith.addf %50, %51 : vector<96x128xf32>
    %cst_33 = arith.constant 0.000000e+00 : f32
    %53 = vector.broadcast %cst_33 : f32 to vector<96x128xf32>
    %54 = arith.maximumf %52, %53 : vector<96x128xf32>
    %55 = vector.extract_strided_slice %54 {offsets = [0, 0], sizes = [64, 128], strides = [1, 1]} : vector<96x128xf32> to vector<64x128xf32>
    %56 = vector.shape_cast %55 : vector<64x128xf32> to vector<4x16x128xf32>
    %57 = vector.extract_strided_slice %54 {offsets = [64, 0], sizes = [32, 128], strides = [1, 1]} : vector<96x128xf32> to vector<32x128xf32>
    %58 = vector.shape_cast %57 : vector<32x128xf32> to vector<4x8x128xf32>
    "tpu.trace_start"() <{level = 10 : i32, message = "bid,bjd->bij"}> : () -> ()
    %cst_34 = arith.constant dense<0.000000e+00> : vector<4x16x8xf32>
    %59 = tpu.matmul %56, %58, %cst_34 {dimension_numbers = #tpu.dot_dimension_numbers<[2], [2], [1], [1], [0, 0, 0, 1, 1, 1], [0], [0]>} : vector<4x16x128xf32>, vector<4x8x128xf32>, vector<4x16x8xf32> -> vector<4x16x8xf32>
    %cst_35 = arith.constant -1.000000e+30 : f32
    "tpu.trace_stop"() : () -> ()
    %60 = vector.shape_cast %10 : vector<4x1x8xi1> to vector<4x1x8xi1>
    %61 = vector.broadcast %60 : vector<4x1x8xi1> to vector<4x16x8xi1>
    %62 = vector.broadcast %cst_35 : f32 to vector<4x16x8xf32>
    %63 = arith.select %61, %62, %59 : vector<4x16x8xi1>, vector<4x16x8xf32>
    %cst_36 = arith.constant dense<0xFF800000> : vector<4x16xf32>
    %64 = vector.multi_reduction <maximumf>, %63, %cst_36 [2] : vector<4x16x8xf32> to vector<4x16xf32>
    %65 = vector.shape_cast %64 : vector<4x16xf32> to vector<4x16x1xf32>
    %66 = vector.broadcast %65 : vector<4x16x1xf32> to vector<4x16x8xf32>
    %67 = arith.subf %63, %66 : vector<4x16x8xf32>
    %68 = math.exp %67 : vector<4x16x8xf32>
    %cst_37 = arith.constant dense<0.000000e+00> : vector<4x16xf32>
    %69 = vector.multi_reduction <add>, %68, %cst_37 [2] : vector<4x16x8xf32> to vector<4x16xf32>
    %70 = vector.shape_cast %69 : vector<4x16xf32> to vector<4x16x1xf32>
    %71 = tpu.reciprocal %70 : vector<4x16x1xf32> -> vector<4x16x1xf32>
    %72 = vector.broadcast %71 : vector<4x16x1xf32> to vector<4x16x8xf32>
    %73 = arith.mulf %68, %72 : vector<4x16x8xf32>
    %74 = vector.broadcast %0 : f32 to vector<4x16x8xf32>
    %75 = arith.mulf %74, %45 : vector<4x16x8xf32>
    %76 = arith.addf %73, %75 : vector<4x16x8xf32>
    %c0_38 = arith.constant 0 : index
    %c0_39 = arith.constant 0 : index
    %c0_40 = arith.constant 0 : index
    %77 = vector.load %arg11[%c0_38, %c0_39, %c0_40] : memref<4x16x8xf32, #tpu.memory_space<vmem>>, vector<4x16x8xf32>
    tpu.vector_store %arg11[%c0_38, %c0_39, %c0_40], %76 {strides = array<i32>} : memref<4x16x8xf32, #tpu.memory_space<vmem>>, vector<4x16x8xf32>,
    "tpu.trace_start"() <{level = 10 : i32, message = "bij,bjd->bid"}> : () -> ()
    %cst_41 = arith.constant dense<0.000000e+00> : vector<4x16x128xf32>
    %78 = tpu.matmul %73, %3, %cst_41 {dimension_numbers = #tpu.dot_dimension_numbers<[2], [1], [1], [2], [0, 0, 0, 1, 1, 2], [0], [0]>} : vector<4x16x8xf32>, vector<4x8x128xf32>, vector<4x16x128xf32> -> vector<4x16x128xf32>
    "tpu.trace_stop"() : () -> ()
    %79 = vector.shape_cast %78 : vector<4x16x128xf32> to vector<64x128xf32>
    %cst_42 = arith.constant dense<0.000000e+00> : vector<64x128xf32>
    %80 = tpu.matmul %79, %6, %cst_42 {dimension_numbers = #tpu.dot_dimension_numbers<[1], [0], [0], [1], [0, 0, 1, 1], [], []>} : vector<64x128xf32>, vector<128x128xf32>, vector<64x128xf32> -> vector<64x128xf32>
    %81 = vector.broadcast %7 : vector<1x128xf32> to vector<64x128xf32>
    %82 = arith.addf %80, %81 : vector<64x128xf32>
    %cst_43 = arith.constant 0.000000e+00 : f32
    %83 = vector.broadcast %cst_43 : f32 to vector<64x128xf32>
    %84 = arith.maximumf %82, %83 : vector<64x128xf32>
    %85 = vector.shape_cast %84 : vector<64x128xf32> to vector<4x16x128xf32>
    "tpu.trace_start"() <{level = 10 : i32, message = "bid,bjd->bij"}> : () -> ()
    %cst_44 = arith.constant dense<0.000000e+00> : vector<4x16x16xf32>
    %86 = tpu.matmul %85, %85, %cst_44 {dimension_numbers = #tpu.dot_dimension_numbers<[2], [2], [1], [1], [0, 0, 0, 1, 1, 1], [0], [0]>} : vector<4x16x128xf32>, vector<4x16x128xf32>, vector<4x16x16xf32> -> vector<4x16x16xf32>
    %cst_45 = arith.constant -1.000000e+30 : f32
    "tpu.trace_stop"() : () -> ()
    %87 = vector.shape_cast %13 : vector<4x1x16xi1> to vector<4x1x16xi1>
    %88 = vector.broadcast %87 : vector<4x1x16xi1> to vector<4x16x16xi1>
    %89 = vector.broadcast %cst_45 : f32 to vector<4x16x16xf32>
    %90 = arith.select %88, %89, %86 : vector<4x16x16xi1>, vector<4x16x16xf32>
    %cst_46 = arith.constant dense<0xFF800000> : vector<4x16xf32>
    %91 = vector.multi_reduction <maximumf>, %90, %cst_46 [2] : vector<4x16x16xf32> to vector<4x16xf32>
    %92 = vector.shape_cast %91 : vector<4x16xf32> to vector<4x16x1xf32>
    %93 = vector.broadcast %92 : vector<4x16x1xf32> to vector<4x16x16xf32>
    %94 = arith.subf %90, %93 : vector<4x16x16xf32>
    %95 = math.exp %94 : vector<4x16x16xf32>
    %cst_47 = arith.constant dense<0.000000e+00> : vector<4x16xf32>
    %96 = vector.multi_reduction <add>, %95, %cst_47 [2] : vector<4x16x16xf32> to vector<4x16xf32>
    %97 = vector.shape_cast %96 : vector<4x16xf32> to vector<4x16x1xf32>
    %98 = tpu.reciprocal %97 : vector<4x16x1xf32> -> vector<4x16x1xf32>
    %99 = vector.broadcast %98 : vector<4x16x1xf32> to vector<4x16x16xf32>
    %100 = arith.mulf %95, %99 : vector<4x16x16xf32>
    %101 = vector.broadcast %1 : f32 to vector<4x16x16xf32>
    %102 = arith.mulf %101, %46 : vector<4x16x16xf32>
    %103 = arith.addf %100, %102 : vector<4x16x16xf32>
    %104 = vector.shape_cast %14 : vector<16x16xf32> to vector<1x16x16xf32>
    %105 = vector.broadcast %104 : vector<1x16x16xf32> to vector<4x16x16xf32>
    %106 = arith.mulf %103, %105 : vector<4x16x16xf32>
    %c0_48 = arith.constant 0 : index
    %c0_49 = arith.constant 0 : index
    %c0_50 = arith.constant 0 : index
    %107 = vector.load %arg12[%c0_48, %c0_49, %c0_50] : memref<4x16x16xf32, #tpu.memory_space<vmem>>, vector<4x16x16xf32>
    tpu.vector_store %arg12[%c0_48, %c0_49, %c0_50], %106 {strides = array<i32>} : memref<4x16x16xf32, #tpu.memory_space<vmem>>, vector<4x16x16xf32>,
    "tpu.trace_start"() <{level = 10 : i32, message = "bij,bjd->bid"}> : () -> ()
    %cst_51 = arith.constant dense<0.000000e+00> : vector<4x16x128xf32>
    %108 = tpu.matmul %106, %78, %cst_51 {dimension_numbers = #tpu.dot_dimension_numbers<[2], [1], [1], [2], [0, 0, 0, 1, 1, 2], [0], [0]>} : vector<4x16x16xf32>, vector<4x16x128xf32>, vector<4x16x128xf32> -> vector<4x16x128xf32>
    "tpu.trace_stop"() : () -> ()
    %c0_52 = arith.constant 0 : index
    %c0_53 = arith.constant 0 : index
    %c0_54 = arith.constant 0 : index
    %109 = vector.load %arg13[%c0_52, %c0_53, %c0_54] : memref<4x16x128xf32, #tpu.memory_space<vmem>>, vector<4x16x128xf32>
    tpu.vector_store %arg13[%c0_52, %c0_53, %c0_54], %108 {strides = array<i32>} : memref<4x16x128xf32, #tpu.memory_space<vmem>>, vector<4x16x128xf32>,
    return
  }
  func.func @transform_0(%arg0: i32) -> i32 {
    %c0_i32 = arith.constant 0 : i32
    %c0_i32_0 = arith.constant 0 : i32
    return %c0_i32 : i32
  }
  func.func @transform_1(%arg0: i32) -> (i32, i32, i32) {
    %c0_i32 = arith.constant 0 : i32
    %c0_i32_0 = arith.constant 0 : i32
    %c0_i32_1 = arith.constant 0 : i32
    return %arg0, %c0_i32, %c0_i32_0 : i32, i32, i32
  }
  func.func @transform_2(%arg0: i32) -> (i32, i32, i32) {
    %c0_i32 = arith.constant 0 : i32
    %c0_i32_0 = arith.constant 0 : i32
    %c0_i32_1 = arith.constant 0 : i32
    return %arg0, %c0_i32, %c0_i32_0 : i32, i32, i32
  }
  func.func @transform_3(%arg0: i32) -> (i32, i32, i32) {
    %c0_i32 = arith.constant 0 : i32
    %c0_i32_0 = arith.constant 0 : i32
    %c0_i32_1 = arith.constant 0 : i32
    return %arg0, %c0_i32, %c0_i32_0 : i32, i32, i32
  }
  func.func @transform_4(%arg0: i32) -> (i32, i32, i32) {
    %c0_i32 = arith.constant 0 : i32
    %c0_i32_0 = arith.constant 0 : i32
    %c0_i32_1 = arith.constant 0 : i32
    return %arg0, %c0_i32, %c0_i32_0 : i32, i32, i32
  }
  func.func @transform_5(%arg0: i32) -> (i32, i32, i32) {
    %c0_i32 = arith.constant 0 : i32
    %c0_i32_0 = arith.constant 0 : i32
    %c0_i32_1 = arith.constant 0 : i32
    return %arg0, %c0_i32, %c0_i32_0 : i32, i32, i32
  }
  func.func @transform_6(%arg0: i32) -> (i32, i32, i32) {
    %c0_i32 = arith.constant 0 : i32
    %c0_i32_0 = arith.constant 0 : i32
    %c0_i32_1 = arith.constant 0 : i32
    return %arg0, %c0_i32, %c0_i32_0 : i32, i32, i32
  }
  func.func @transform_7(%arg0: i32) -> (i32, i32) {
    %c0_i32 = arith.constant 0 : i32
    %c0_i32_0 = arith.constant 0 : i32
    %c0_i32_1 = arith.constant 0 : i32
    return %c0_i32, %c0_i32_0 : i32, i32
  }
  func.func @transform_8(%arg0: i32) -> (i32, i32) {
    %c0_i32 = arith.constant 0 : i32
    %c0_i32_0 = arith.constant 0 : i32
    %c0_i32_1 = arith.constant 0 : i32
    return %c0_i32, %c0_i32_0 : i32, i32
  }
  func.func @transform_9(%arg0: i32) -> (i32, i32) {
    %c0_i32 = arith.constant 0 : i32
    %c0_i32_0 = arith.constant 0 : i32
    %c0_i32_1 = arith.constant 0 : i32
    return %c0_i32, %c0_i32_0 : i32, i32
  }
  func.func @transform_10(%arg0: i32) -> (i32, i32, i32) {
    %c0_i32 = arith.constant 0 : i32
    %c0_i32_0 = arith.constant 0 : i32
    %c0_i32_1 = arith.constant 0 : i32
    return %arg0, %c0_i32, %c0_i32_0 : i32, i32, i32
  }
  func.func @transform_11(%arg0: i32) -> (i32, i32, i32) {
    %c0_i32 = arith.constant 0 : i32
    %c0_i32_0 = arith.constant 0 : i32
    %c0_i32_1 = arith.constant 0 : i32
    return %arg0, %c0_i32, %c0_i32_0 : i32, i32, i32
  }
  func.func @transform_12(%arg0: i32) -> (i32, i32, i32) {
    %c0_i32 = arith.constant 0 : i32
    %c0_i32_0 = arith.constant 0 : i32
    %c0_i32_1 = arith.constant 0 : i32
    return %arg0, %c0_i32, %c0_i32_0 : i32, i32, i32
  }
}

</mosaic_0001>

<bundles_post_ra>
// kernel: tpu_custom_call.1
= control target key start
LH: loop header
LB: loop body
LE: loop exit
PB: predicated region body
PF: predicated region fallthrough
CT: control target
= control target key end

     0   :  { %s5774_s0 = inlined_call_operand.vmem [shape: f32[2], index: 0, kind: input, shape index: {}]   ;;  %s5775_s1 = inlined_call_operand.vmem [shape: f32[8,16,128], index: 1, kind: input, shape index: {}]   ;;  %s5776_s2 = inlined_call_operand.vmem [shape: f32[8,8,128], index: 2, kind: input, shape index: {}]   ;;  %s5777_s3 = inlined_call_operand.hbm [shape: s32[8,1,8], index: 3, kind: input, shape index: {}]   ;;  %s5778_s4 = inlined_call_operand.hbm [shape: s32[8,1,16], index: 4, kind: input, shape index: {}]   ;;  %s5779_s5 = inlined_call_operand.vmem [shape: f32[8,16,8], index: 5, kind: input, shape index: {}]   ;;  %s5780_s6 = inlined_call_operand.hbm [shape: f32[8,16,16], index: 6, kind: input, shape index: {}]   ;;  %s5781_s7 = inlined_call_operand.hbm [shape: f32[128,128], index: 7, kind: input, shape index: {}]   ;;  %s5782_s8 = inlined_call_operand.vmem [shape: f32[1,128], index: 8, kind: input, shape index: {}]   ;;  %s5783_s9 = inlined_call_operand.hbm [shape: f32[16,16], index: 9, kind: input, shape index: {}]   ;;  %s5784_s10 = inlined_call_operand.vmem [shape: f32[8,16,8], index: 10, kind: output, shape index: {0}]   ;;  %s5785_s11 = inlined_call_operand.hbm [shape: f32[8,16,16], index: 11, kind: output, shape index: {1}]   ;;  %s5786_s12 = inlined_call_operand.hbm [shape: f32[8,16,128], index: 12, kind: output, shape index: {2}]  }
   0x1   :  { %5810 = sst [smem:[#allocation28_spill]] %s5774_s0 }
   0x2   :  { %5811 = sst [smem:[#allocation29_spill]] %s5777_s3 }
   0x3   :  { %5812 = sst [smem:[#allocation30_spill]] %s5778_s4 }
   0x4   :  { %5813 = sst [smem:[#allocation31_spill]] %s5781_s7 }
   0x5   :  { %5814 = sst [smem:[#allocation32_spill]] %s5784_s10 }
   0x6   :  { %5815 = sst [smem:[#allocation33_spill]] %s5785_s11 }
   0x7   :  { %5816 = sst [smem:[#allocation34_spill]] %s5786_s12 }
   0x8   :  { %18 = vsyncpa [#allocation5], 0 }
   0x9   :  { %19 = vsyncpa [#allocation3], 0 }
   0xa   :  { %21 = vsyncpa [#allocation3 + $0x1], 0 }
   0xb   :  { %22 = vsyncpa [#allocation8], 0 }
   0xc   :  { %24 = vsyncpa [#allocation8 + $0x1], 0 }
   0xd   :  { %25 = vsyncpa [#allocation11], 0 }
   0xe   :  { %26 = vsyncpa [#allocation4], 0 }
   0xf   :  { %28 = vsyncpa [#allocation4 + $0x1], 0 }
  0x10   :  { %29 = vsyncpa [#allocation15], 0 }
  0x11   :  { %31 = vsyncpa [#allocation15 + $0x1], 0  ;;  %s4800_s21 = smov 0   ;;  %s4802_s22 = smov 0  }
  0x12   :  { %s4804_s23 = smov 0   ;;  %s4806_s24 = smov 0  }
  0x13 LB: > { %5817 = sst [smem:[#allocation22_spill]] %s4706_s21  ;;  %s4821_s25 = sadd.s32 4294967295, %s4718_s24   ;;  %s4718_s24 = sphi %s4806_s24, %s5860_s24   ;;  %s4714_s23 = sphi %s4804_s23, %s5862_s23   ;;  %s4710_s22 = sphi %s4802_s22, %s5864_s22   ;;  %s4706_s21 = sphi %s4800_s21, %s5863_s21  }
  0x14   : > { %5818 = sst [smem:[#allocation23_spill]] %s4714_s23  ;;  %s3741_s26 = sadd.s32 4294967294, %s4718_s24  }
  0x15   : > { %s4825_s27 = sadd.s32 1, %s4718_s24   ;;  %s117_s28 = sadd.s32 1, %s4714_s23 }
  0x16   : > { %5819 = sst [smem:[#allocation24_spill]] %s4825_s27  ;;  %s114_s29 = ssub.s32 %s4718_s24, %s4825_s27 }
  0x17   : > { %p124_p0 = scmp.ne.s32.totalorder %s4714_s23, %s4710_s22  ;;  %p115_p1 = scmp.eq.s32.totalorder %s114_s29, 0 }
  0x18   : > { %p125_p2 = scmp.eq.s32.totalorder %s4718_s24, 0  ;;  %p130_p3 = scmp.ne.s32.totalorder %s4710_s22, %s4706_s21 }
  0x19   : > { %p5787_p4 = scmp.eq.s32.totalorder %s4821_s25, 0  ;;  %p321_p7 = scmp.eq.s32.totalorder %s4821_s25, 1 }
  0x1a   : > { %s4837_s30 = scalar_select %p115_p1, %s4714_s23, %s117_s28  }
  0x1b   : > { %p4839_p5 = por %p125_p2, %p124_p0  ;;  %p4845_p6 = por %p5787_p4, %p130_p3 }
  0x1c   : > { %5820 = sst [smem:[#allocation25_spill]] %s4837_s30  ;;  %p327_p8 = scmp.eq.s32.totalorder %s3741_s26, 1 }
  0x1d   : > { %s5822_s14 = scalar_select %p4845_p6, 1, 0 }
  0x1e   : > { %p3742_p9 = scmp.ge.s32.totalorder %s4718_s24, 1  ;;  %p360_p10 = scmp.lt.s32.totalorder %s4718_s24, 3 }
  0x1f   : > { %p4852_p11 = por %p321_p7, %p124_p0  ;;  %p4856_p12 = por %p327_p8, %p130_p3 }
  0x20   : > { %p4860_p13 = pnand %p3742_p9, %p360_p10  ;;  %s4720_s18 = smov [#allocation10]  }
  0x21   : > { %s5823_s15 = scalar_select %p4852_p11, 1, 0 }
  0x22   : > { %s5825_s16 = scalar_select %p4856_p12, 1, 0 }
  0x23   : > { %5824 = sst [smem:[#allocation26_spill]] %s5823_s15  ;;  %p4240_p1 = pneg %p4860_p13 }
  0x24   : > { %5826 = sst [smem:[#allocation27_spill]] %s5825_s16  ;;  %s383_s19 = sshll.u32 %s4720_s18, 4  ;;  %s384_s19 = int_to_ptr.vmem [resolvable:$true] %s383_s19 }
  0x25   : > { %s5827_s17 = scalar_select %p4860_p13, 1, 0 }
  0x26   : > { %p4868_p2 = pnand %p4240_p1, %p5787_p4  ;;  %p4270_p3 = scmp.lt.s32.totalorder %s4718_s24, 2 }
  0x27   : > { %s4875_s26 = sand.u32 1, %s4714_s23   ;;  %s4472_s29 = scalar_lea.vmem %s384_s19, 2048 }
  0x28   : > { %s5828_s20 = scalar_select %p4868_p2, 1, 0 }
  0x29   : > { %p5803_p7 = pneg %p4868_p2  ;;  %p4473_p8 = scmp.ne.s32.totalorder %s384_s19, %s4472_s29 }
  0x2a   : > { %p4480_p1 = scmp.lt.s32.totalorder %s384_s19, %s384_s19  ;;  %p4481_p4 = scmp.lt.s32.totalorder %s4472_s29, %s4472_s29 }
  0x2b   : > { %p4475_p9 = pnand %p4473_p8, %p5803_p7 }
  0x2c   : > { %p4482_p12 = por %p4481_p4, %p4480_p1 }
  0x2d   : > { %p4476_p10 = pneg %p4475_p9 }
  0x2f   : > { %p4483_p11 = pnand %p4482_p12, %p4476_p10 }
  0x31   : > { %4486 = shalt.err (!%p4483_p11)
}
  0x32   : > { %s5798_s18 = smov 128   ;;  %s5800_s28 = smov 8  }
  0x33   : > { %s5829_s7 = sld [smem:[#allocation31_spill]]  ;;  %s5802_s29 = sshll.u32 %s4718_s24, 6 }
  0x34   : > { %p4896_p4 = pnand %p4270_p3, %p4839_p5  ;;  %s453_s16 = sand.u32 1, %s4718_s24  }
  0x35   : > { %s5831_s4 = sld [smem:[#allocation30_spill]]  ;;  %s5832_s15 = sshll.u32 %s4875_s26, 2 }
  0x36   : > { %s457_s23 = scalar_lea.vmem [#allocation7], %s5832_s15  ;;  %s5833_s0 = sld [smem:[#allocation28_spill]] }
  0x37   : > { %s464_s30 = sshll.u32 %s457_s23, 4  ;;  %p4921_p11 = pneg %p4896_p4  ;;  %s4910_s30 = int_to_ptr.vmem [resolvable:$true] %s464_s30 }
  0x39   : > { %4246 = dma.hbm_to_vmem [thread:$0]  (!%p4868_p2), %s5829_s7, 2048, %s384_s19, [#allocation11], %s5798_s18, %s5798_s18, %s5800_s28  }
  0x3a   : > { %s4915_s28 = scalar_lea.sflag [#allocation8], %s453_s16 }
  0x3b   : > { %s4906_s11 = scalar_lea.hbm %s5831_s4, %s5802_s29  ;;  %s4492_s23 = scalar_lea.hbm %s5831_s4, 128 }
  0x3c   : > { %s373_s18 = sshll.u32 %s5833_s0, 4  ;;  %s4487_s7 = scalar_lea.hbm %s4906_s11, 64  ;;  %s374_s18 = int_to_ptr.vmem [resolvable:$true] %s373_s18 }
  0x3d   : > { %p4488_p5 = scmp.ne.s32.totalorder %s4906_s11, %s4487_s7  ;;  %p4493_p8 = scmp.lt.s32.totalorder %s4906_s11, %s5831_s4 }
  0x3e   : > { %p4494_p9 = scmp.lt.s32.totalorder %s4492_s23, %s4487_s7 }
  0x3f   : > { %p4490_p12 = pnand %p4921_p11, %p4488_p5 }
  0x40   : > { %p4495_p10 = por %p4494_p9, %p4493_p8 }
  0x41   : > { %p4491_p3 = pneg %p4490_p12 }
  0x43   : > { %p4496_p1 = pnand %p4495_p10, %p4491_p3 }
  0x45   : > { %4499 = shalt.err (!%p4496_p1)
}
  0x46   : > { %s4500_s16 = scalar_lea.vmem %s4910_s30, 64  ;;  %s4723_s19 = smov [#allocation7]  }
  0x47   : > { %p4501_p0 = scmp.ne.s32.totalorder %s4910_s30, %s4500_s16  ;;  %s4505_s21 = sshll.u32 %s4723_s19, 4  ;;  %s4506_s21 = int_to_ptr.vmem [resolvable:$false] %s4505_s21 }
  0x48   : > { %s4507_s15 = scalar_lea.vmem %s4506_s21, 128  ;;  %p4508_p7 = scmp.lt.s32.totalorder %s4910_s30, %s4506_s21 }
  0x49   : > { %p4503_p5 = pnand %p4501_p0, %p4921_p11  ;;  %p4509_p6 = scmp.lt.s32.totalorder %s4507_s15, %s4500_s16 }
  0x4b   : > { %p4504_p12 = pneg %p4503_p5  ;;  %p4510_p13 = por %p4509_p6, %p4508_p7 }
  0x4d   : > { %p4511_p2 = pnand %p4510_p13, %p4504_p12 }
  0x4f   : > { %4514 = shalt.err (!%p4511_p2)
}
  0x50   : > { %s5808_s7 = smov 16   ;;  %s5809_s29 = smov 1  }
  0x51   : > { %4256 = dma.hbm_to_vmem [thread:$0]  (!%p4896_p4), %s4906_s11, 64, %s4910_s30, %s4915_s28, %s5808_s7, %s5808_s7, %s5809_s29  }
  0x52   : > { %s4515_s16 = scalar_lea.vmem %s374_s18, 16  ;;  %p5835_p13 = scmp.ne.s32.totalorder %s5828_s20, 0 }
  0x53   : > { %p4516_p6 = scmp.ne.s32.totalorder %s374_s18, %s4515_s16  ;;  %p4523_p3 = scmp.lt.s32.totalorder %s374_s18, %s374_s18 }
  0x54   : > { %p5836_p2 = pneg %p5835_p13  ;;  %p4524_p8 = scmp.lt.s32.totalorder %s4515_s16, %s4515_s16 }
  0x56   : > { %p4518_p0 = pnand %p4516_p6, %p5836_p2  ;;  %p4525_p9 = por %p4524_p8, %p4523_p3 }
  0x58   : > { %p4519_p7 = pneg %p4518_p0 }
  0x5a   : > { %p4526_p10 = pnand %p4525_p9, %p4519_p7 }
  0x5c   : > { %4529 = shalt.err (!%p4526_p10)
}
  0x5d   : > { %s4726_s19 = smov [#allocation2]   ;;  %s4727_s11 = smov [#allocation12]  }
  0x5e   : > { %4243 = dma.vmem_to_smem (!%p5835_p13), %s374_s18, 16, %s4726_s19, [#allocation5]  }
  0x5f   : > { %s399_s30 = sshll.u32 %s4727_s11, 4  ;;  %s5837_s21 = sshll.u32 %s4718_s24, 6  ;;  %s400_s30 = int_to_ptr.vmem [resolvable:$true] %s399_s30 }
  0x60   : > { %s5838_s3 = sld [smem:[#allocation29_spill]]  ;;  %s4541_s7 = scalar_lea.vmem %s400_s30, 256 }
  0x61   : > { %p4542_p1 = scmp.ne.s32.totalorder %s400_s30, %s4541_s7  ;;  %p5839_p5 = pmov %p5836_p2 }
  0x62   : > { %p4549_p2 = scmp.lt.s32.totalorder %s400_s30, %s400_s30  ;;  %p4550_p0 = scmp.lt.s32.totalorder %s4541_s7, %s4541_s7 }
  0x63   : > { %p4544_p12 = pnand %p4542_p1, %p5839_p5 }
  0x64   : > { %p4551_p7 = por %p4550_p0, %p4549_p2 }
  0x65   : > { %p4545_p6 = pneg %p4544_p12 }
  0x66   : > { %s4961_s13 = scalar_lea.hbm %s5838_s3, %s5837_s21 }
  0x67   : > { %p4552_p3 = pnand %p4551_p7, %p4545_p6 }
  0x69   : > { %4555 = shalt.err (!%p4552_p3)
}
  0x6a   : > { %s5840_s18 = smov 8   ;;  %s5841_s16 = smov 128  }
  0x6b   : > { %4249 = dma.hbm_to_vmem [thread:$0]  (!%p5835_p13), %s5783_s9, 256, %s400_s30, [#allocation11], %s5841_s16, %s5841_s16, %s5840_s18  }
  0x6c   : > { %s5842_s7 = sshll.u32 %s4875_s26, 2  ;;  %s3753_s23 = sshll.u32 %s4875_s26, 6 }
  0x6d   : > { %s436_s21 = scalar_lea.vmem [#allocation6], %s5842_s7  ;;  %s433_s20 = scalar_lea.sflag [#allocation3], %s4875_s26 }
  0x6e   : > { %s443_s15 = sshll.u32 %s436_s21, 4  ;;  %s4556_s29 = scalar_lea.hbm %s4961_s13, 64  ;;  %s4977_s15 = int_to_ptr.vmem [resolvable:$true] %s443_s15 }
  0x6f   : > { %p4557_p8 = scmp.ne.s32.totalorder %s4961_s13, %s4556_s29  ;;  %s4561_s0 = scalar_lea.hbm %s5838_s3, 128 }
  0x70   : > { %p4562_p13 = scmp.lt.s32.totalorder %s4961_s13, %s5838_s3  ;;  %p4563_p1 = scmp.lt.s32.totalorder %s4561_s0, %s4556_s29 }
  0x71   : > { %p4559_p9 = pnand %p4557_p8, %p4921_p11 }
  0x72   : > { %p4564_p5 = por %p4563_p1, %p4562_p13 }
  0x73   : > { %p4560_p10 = pneg %p4559_p9 }
  0x75   : > { %p4565_p12 = pnand %p4564_p5, %p4560_p10 }
  0x77   : > { %4568 = shalt.err (!%p4565_p12)
}
  0x78   : > { %s4569_s30 = scalar_lea.vmem %s4977_s15, 64  ;;  %s4728_s7 = smov [#allocation6]  }
  0x79   : > { %p4570_p6 = scmp.ne.s32.totalorder %s4977_s15, %s4569_s30  ;;  %s4574_s21 = sshll.u32 %s4728_s7, 4  ;;  %s4575_s21 = int_to_ptr.vmem [resolvable:$false] %s4574_s21 }
  0x7a   : > { %s4576_s19 = scalar_lea.vmem %s4575_s21, 128  ;;  %p4577_p7 = scmp.lt.s32.totalorder %s4977_s15, %s4575_s21 }
  0x7b   : > { %p4572_p2 = pnand %p4570_p6, %p4921_p11  ;;  %p4578_p3 = scmp.lt.s32.totalorder %s4576_s19, %s4569_s30 }
  0x7d   : > { %p4573_p0 = pneg %p4572_p2  ;;  %p4579_p8 = por %p4578_p3, %p4577_p7 }
  0x7f   : > { %p4580_p9 = pnand %p4579_p8, %p4573_p0 }
  0x81   : > { %4583 = shalt.err (!%p4580_p9)
}
  0x82   : > { %s5843_s0 = smov 1   ;;  %s5844_s4 = smov 16  }
  0x83   : > { %4253 = dma.hbm_to_vmem [thread:$0]  (!%p4896_p4), %s4961_s13, 64, %s4977_s15, %s433_s20, %s5844_s4, %s5844_s4, %s5843_s0  }
  0x84   : > { %s3824_s10 = sshll.u32 %s4718_s24, 10  ;;  %s488_s29 = scalar_lea.vmem [#allocation9], %s3753_s23 }
  0x85   : > { %s496_s11 = sshll.u32 %s488_s29, 4  ;;  %s5009_s21 = scalar_lea.hbm %s5780_s6, %s3824_s10  ;;  %s497_s11 = int_to_ptr.vmem [resolvable:$true] %s496_s11 }
  0x86   : > { %s4584_s19 = scalar_lea.hbm %s5009_s21, 1024  ;;  %s4589_s26 = scalar_lea.hbm %s5780_s6, 2048 }
  0x87   : > { %p4585_p10 = scmp.ne.s32.totalorder %s5009_s21, %s4584_s19  ;;  %p4590_p5 = scmp.lt.s32.totalorder %s5009_s21, %s5780_s6 }
  0x88   : > { %p4591_p12 = scmp.lt.s32.totalorder %s4589_s26, %s4584_s19 }
  0x89   : > { %p4587_p13 = pnand %p4585_p10, %p4921_p11 }
  0x8a   : > { %p4592_p6 = por %p4591_p12, %p4590_p5 }
  0x8b   : > { %p4588_p1 = pneg %p4587_p13 }
  0x8d   : > { %p4593_p2 = pnand %p4592_p6, %p4588_p1 }
  0x8f   : > { %4596 = shalt.err (!%p4593_p2)
}
  0x90   : > { %s4597_s20 = scalar_lea.vmem %s497_s11, 1024  ;;  %s4729_s0 = smov [#allocation9]  }
  0x91   : > { %p4598_p0 = scmp.ne.s32.totalorder %s497_s11, %s4597_s20  ;;  %s4602_s4 = sshll.u32 %s4729_s0, 4  ;;  %s4603_s4 = int_to_ptr.vmem [resolvable:$false] %s4602_s4 }
  0x92   : > { %s4604_s10 = scalar_lea.vmem %s4603_s4, 2048  ;;  %p4605_p8 = scmp.lt.s32.totalorder %s497_s11, %s4603_s4 }
  0x93   : > { %p4600_p7 = pnand %p4598_p0, %p4921_p11  ;;  %p4606_p9 = scmp.lt.s32.totalorder %s4604_s10, %s4597_s20 }
  0x95   : > { %p4601_p3 = pneg %p4600_p7  ;;  %p4607_p10 = por %p4606_p9, %p4605_p8 }
  0x97   : > { %p4608_p13 = pnand %p4607_p10, %p4601_p3 }
  0x99   : > { %4611 = shalt.err (!%p4608_p13)
}
  0x9a   : > { %4259 = dma.hbm_to_vmem [thread:$0]  (!%p4896_p4), %s5009_s21, 1024, %s497_s11, %s4915_s28, %s5841_s16, %s5841_s16, %s5840_s18  }
  0x9b   : > { %p5845_p11 = scmp.ne.s32.totalorder %s5827_s17, 0 }
  0x9c   : > { %p5846_p1 = scmp.eq.s32.totalorder (!%p5845_p11), %s4821_s25, 0 }
  0x9d   : > { %508 = sbr.rel (%p5845_p11) target bundleno = 2415 (0x96f), region = 60 }
  0xa2   : > { %4681 = dma.done.wait (%p5846_p1), [#allocation5], 16   ;;  %p5847_p5 = pmov %p5846_p1 }
  0xa3   : > { %s5038_s3 = sand.u32 1, %s4710_s22   ;;  %p5848_p4 = scmp.ne.s32.totalorder %s5822_s14, 0 }
  0xa4   : > { %4683 = vsyncadd (%p5847_p5), [#allocation5], 4294967280  ;;  %s3759_s27 = sshll.u32 %s5038_s3, 2  ;;  %s515_s12 = scalar_lea.sflag [#allocation3], %s5038_s3 }
  0xa5   : > { %s5042_s29 = scalar_lea.vmem [#allocation6], %s3759_s27 }
  0xa6   : > { %4685 = dma.done.wait (%p5848_p4), %s515_s12, 64  }
  0xa7   : > { %4687 = vsyncadd (%p5848_p4), %s515_s12, 4294967232  ;;  %s523_s17 = sand.u32 1, %s4821_s25   ;;  %s5049_s18 = scalar_lea.vmem [#allocation7], %s3759_s27 }
  0xa8   : > { %s524_s28 = scalar_lea.sflag [#allocation8], %s523_s17 }
  0xa9   : > { %4689 = dma.done.wait (%p5848_p4), %s524_s28, 1088  }
  0xaa   : > { %4691 = vsyncadd (%p5848_p4), %s524_s28, 4294966208  ;;  %s5056_s16 = sshll.u32 %s5038_s3, 6  ;;  %p5849_p12 = pmov %p5846_p1 }
  0xab   : > { %s5059_s11 = scalar_lea.vmem [#allocation9], %s5056_s16 }
  0xac   : > { %4693 = dma.done.wait (%p5849_p12), [#allocation11], 2304   ;;  %p5850_p6 = pmov %p5846_p1 }
  0xae   : > { %4695 = vsyncadd (%p5850_p6), [#allocation11], 4294964992 }
  0xaf   : > { %549 = sfence }
  0xb0   : > { %v5066_v0 = vld [vmem:[%s5059_s11] sm:$0xff]  ;;  %vm721_vm0 = vcmask 130048   ;;  %v5072_v2 = vld [vmem:[%s5059_s11 + $0x8] sm:$0xff]  ;;  %s3766_s14 = sshll.u32 %s4821_s25, 2  ;;  %vm910_vm1 = vcmask 64512   ;;  %s656_s12 = sld [smem:[#allocation2]] }
  0xb1   : > { %v5069_v1 = vld [vmem:[%s5059_s11 + $0x20] sm:$0xff]  ;;  %v722_v3 = vsel %vm721_vm0, %v5066_v0, -inf  ;;  %v725_v5 = vsel %vm721_vm0, %v5072_v2, -inf  ;;  %v5081_v6 = vld [vmem:[%s5059_s11 + $0x28] sm:$0xff]  ;;  %p625_p2 = scmp.lt.s32.totalorder %s3766_s14, 7  ;;  %s5851_s28 = sld [smem:[#allocation32_spill]] }
  0xb2   : > { %v734_v4 = vsel %vm721_vm0, %v5069_v1, -inf  ;;  %723 = vmax.xlane.f32.xlu0 %v722_v3  ;;  %v5083_v7 = vmax.f32 %v722_v3, %v725_v5  ;;  %v737_v8 = vsel %vm721_vm0, %v5081_v6, -inf  ;;  %s3829_s30 = sshll.u32 %s4821_s25, 10  ;;  %s5853_s13 = sld [smem:[#allocation33_spill]] }
  0xb3   : > { %735 = vmax.xlane.f32.xlu1 %v734_v4  ;;  %v5087_v9 = vmax.f32 %v734_v4, %v737_v8  ;;  %s5866_s14 = smov (!%p625_p2, %s3766_s14), 7  ;;  %s4731_s0 = smov [#allocation13]  }
  0xb4   : > { %s5093_s7 = sshll.u32 %s5866_s14, 4  ;;  %s3770_s23 = sshll.u32 %s5866_s14, 3 }
  0xb5   : > { %s5099_s19 = scalar_lea.vmem %s5779_s5, %s5093_s7  ;;  %s5241_s15 = scalar_lea.vmem %s5775_s1, %s5093_s7 }
  0xb6   : > { %726 = vmax.xlane.f32.xlu0 %v725_v5  ;;  %v670_v10 = vld [vmem:[%s5099_s19] sm:$0xff]  ;;  %v671_v11 = vld [vmem:[%s5099_s19 + $0x8] sm:$0xff]  ;;  %s635_s4 = scalar_lea.vmem %s5776_s2, %s3770_s23  ;;  %s5633_s14 = scalar_lea.vmem [#allocation13], %s5056_s16 }
  0xb7   : > { %738 = vmax.xlane.f32.xlu1 %v737_v8  ;;  %v911_v12 = vsel %vm910_vm1, %v670_v10, -inf  ;;  %v912_v13 = vsel %vm910_vm1, %v671_v11, -inf  ;;  %v674_v16 = vld [vmem:[%s5099_s19 + $0x20] sm:$0xff]  ;;  %v675_v17 = vld [vmem:[%s5099_s19 + $0x28] sm:$0xff]  ;;  %s3460_s23 = scalar_lea.sflag [#allocation4], %s5038_s3 }
  0xb8   : > { %v913_v14 = vmax.f32 %v911_v12, %v912_v13  ;;  %v929_v18 = vsel %vm910_vm1, %v674_v16, -inf  ;;  %v930_v19 = vsel %vm910_vm1, %v675_v17, -inf  ;;  %v5127_v8 = vld [vmem:[%s5059_s11 + $0x10] sm:$0xff]  ;;  %s5691_s26 = scalar_lea.hbm %s5853_s13, %s3829_s30 }
  0xb9   : > { %v931_v21 = vmax.f32 %v929_v18, %v930_v19  ;;  %v5141_v19 = vld [vmem:[%s5059_s11 + $0x30] sm:$0xff] }
  0xba   : > { %v914_v15 = vrot.slane %v913_v14, 4 }
  0xbb   : > { %v932_v23 = vrot.slane %v931_v21, 4 }
  0xbc   : > { %v915_v20 = vmax.f32 %v913_v14, %v914_v15  ;;  %v5136_v15 = vsel %vm721_vm0, %v5127_v8, -inf }
  0xbd   : > { %v933_v25 = vmax.f32 %v931_v21, %v932_v23  ;;  %v5149_v23 = vsel %vm721_vm0, %v5141_v19, -inf }
  0xbe   : > { %v916_v22 = vrot.slane %v915_v20, 2 }
  0xbf   : > { %v934_v27 = vrot.slane %v933_v25, 2 }
  0xc0   : > { %v917_v24 = vmax.f32 %v915_v20, %v916_v22  ;;  %v5144_v20 = vld [vmem:[%s5059_s11 + $0x18] sm:$0xff] }
  0xc1   : > { %v935_v29 = vmax.f32 %v933_v25, %v934_v27  ;;  %v5156_v27 = vld [vmem:[%s5059_s11 + $0x38] sm:$0xff]  ;;  %s5512_s11 = scalar_lea.vmem %s5851_s28, %s5093_s7  ;;  %s5852_s7 = sld [smem:[#allocation26_spill]] }
  0xc2   : > { %v918_v26 = vrot.slane %v917_v24, 1 }
  0xc3   : > { %v936_v32 = vrot.slane %v935_v29, 1 }
  0xc4   : > { %v919_v28 = vmax.f32 %v917_v24, %v918_v26  ;;  %v5153_v24 = vsel %vm721_vm0, %v5144_v20, -inf }
  0xc5   : > { %v937_v35 = vmax.f32 %v935_v29, %v936_v32  ;;  %v5162_v29 = vsel %vm721_vm0, %v5156_v27, -inf }
  0xc6   : > { %v947_v30 = vsub.f32 %v670_v10, %v919_v28  ;;  %v948_v31 = vsub.f32 %v671_v11, %v919_v28 }
  0xc7   : > { %v951_v40 = vsub.f32 %v674_v16, %v937_v35  ;;  %v952_v41 = vsub.f32 %v675_v17, %v937_v35  ;;  %p5854_p7 = scmp.ne.s32.totalorder %s5852_s7, 0 }
  0xc8   : > { %v955_v33 = vmul.f32 1.442695, %v947_v30  ;;  %v957_v34 = vmul.f32 1.442695, %v948_v31 }
  0xc9   : > { %v963_v44 = vmul.f32 1.442695, %v951_v40  ;;  %v965_v47 = vmul.f32 1.442695, %v952_v41  ;;  %v825_v40 = vrot.slane %v5087_v9, 4 }
  0xca   : > { %4317 = vpow2.f32 %v955_v33 }
  0xcb   : > { %4319 = vpow2.f32 %v957_v34 }
  0xd7   : > { %v4318_v52 = vpop.eup %4317 }
  0xd8   : > { %v4320_v53 = vpop.eup %4319  ;;  %v971_v54 = vsel %vm910_vm1, %v4318_v52, 0.0 }
  0xd9   : > { %v972_v55 = vsel %vm910_vm1, %v4320_v53, 0.0 }
  0xda   : > { %v973_v56 = vadd.f32 %v972_v55, %v971_v54 }
  0xdc   : > { %v974_v60 = vrot.slane %v973_v56, 4 }
  0xde   : > { %v975_v3 = vadd.f32 %v974_v60, %v973_v56 }
  0xe0   : > { %v976_v13 = vrot.slane %v975_v3, 2 }
  0xe2   : > { %v977_v17 = vadd.f32 %v976_v13, %v975_v3 }
  0xe4   : > { %v978_v21 = vrot.slane %v977_v17, 1 }
  0xe6   : > { %v979_v25 = vadd.f32 %v978_v21, %v977_v17 }
 0x13b   : > { %v724_v36 = vpop.xlane.xlu0 %723 }
 0x13c   : > { %v736_v37 = vpop.xlane.xlu1 %735  ;;  %v746_v38 = vsub.f32 %v5066_v0, %v724_v36 }
 0x13d   : > { %v750_v39 = vsub.f32 %v5069_v1, %v736_v37 }
 0x13e   : > { %v754_v42 = vmul.f32 1.442695, %v746_v38  ;;  %v811_v38 = vrot.slane %v5083_v7, 4 }
 0x13f   : > { %v762_v43 = vmul.f32 1.442695, %v750_v39  ;;  %v727_v45 = vpop.xlane.xlu0 %726 }
 0x140   : > { %v739_v46 = vpop.xlane.xlu1 %738  ;;  %4321 = vpow2.f32 %v754_v42  ;;  %v747_v48 = vsub.f32 %v5072_v2, %v727_v45  ;;  %v812_v39 = vmax.f32 %v5083_v7, %v811_v38  ;;  %v826_v42 = vmax.f32 %v5087_v9, %v825_v40 }
 0x141   : > { %v751_v49 = vsub.f32 %v5081_v6, %v739_v46  ;;  %4323 = vpow2.f32 %v762_v43 }
 0x142   : > { %v756_v50 = vmul.f32 1.442695, %v747_v48  ;;  %4325 = vpow2.f32 %v963_v44  ;;  %v813_v41 = vrot.slane %v812_v39, 2  ;;  %v827_v44 = vrot.slane %v826_v42, 2 }
 0x143   : > { %v764_v51 = vmul.f32 1.442695, %v751_v49  ;;  %4327 = vpow2.f32 %v965_v47 }
 0x144   : > { %4329 = vpow2.f32 %v756_v50  ;;  %v814_v43 = vmax.f32 %v812_v39, %v813_v41  ;;  %v828_v46 = vmax.f32 %v826_v42, %v827_v44 }
 0x145   : > { %4331 = vpow2.f32 %v764_v51 }
 0x146   : > { %4333 = vrcp.f32 %v979_v25  ;;  %v815_v45 = vrot.slane %v814_v43, 1  ;;  %v829_v48 = vrot.slane %v828_v46, 1 }
 0x148   : > { %v816_v47 = vmax.f32 %v814_v43, %v815_v45  ;;  %v830_v50 = vmax.f32 %v828_v46, %v829_v48 }
 0x14a   : > { %v838_v49 = vsub.f32 %v5066_v0, %v816_v47  ;;  %v839_v51 = vsub.f32 %v5072_v2, %v816_v47  ;;  %v843_v54 = vsub.f32 %v5081_v6, %v830_v50 }
 0x14c   : > { %v848_v7 = vmul.f32 1.442695, %v839_v51  ;;  %v856_v9 = vmul.f32 1.442695, %v843_v54 }
 0x14d   : > { %v5115_v57 = vpop.eup %4321 }
 0x14e   : > { %v5117_v58 = vpop.eup %4323  ;;  %v770_v59 = vsel %vm721_vm0, %v5115_v57, 0.0 }
 0x14f   : > { %v4326_v61 = vpop.eup %4325  ;;  %771 = vadd.xlane.f32.xlu0 %v770_v59  ;;  %v782_v63 = vsel %vm721_vm0, %v5117_v58, 0.0 }
 0x150   : > { %v4328_v62 = vpop.eup %4327  ;;  %v989_v4 = vsel %vm910_vm1, %v4326_v61, 0.0 }
 0x151   : > { %v5124_v5 = vpop.eup %4329  ;;  %v990_v10 = vsel %vm910_vm1, %v4328_v62, 0.0 }
 0x152   : > { %v5130_v11 = vpop.eup %4331  ;;  %v773_v12 = vsel %vm721_vm0, %v5124_v5, 0.0  ;;  %v991_v14 = vadd.f32 %v990_v10, %v989_v4 }
 0x153   : > { %783 = vadd.xlane.f32.xlu0 %v782_v63  ;;  %774 = vadd.xlane.f32.xlu1 %v773_v12  ;;  %v785_v16 = vsel %vm721_vm0, %v5130_v11, 0.0  ;;  %v4334_v32 = vpop.eup %4333 }
 0x154   : > { %v992_v18 = vrot.slane %v991_v14, 4  ;;  %v1012_v33 = vmul.f32 %v4334_v32, %v4320_v53  ;;  %v1011_v34 = vmul.f32 %v4334_v32, %v4318_v52  ;;  %v846_v52 = vmul.f32 1.442695, %v838_v49 }
 0x155   : > { %v842_v53 = vsub.f32 %v5069_v1, %v830_v50 }
 0x156   : > { %v993_v22 = vadd.f32 %v992_v18, %v991_v14  ;;  %3972 = vmatprep.subr.mxu0 %v1012_v33  ;;  %v672_v14 = vld [vmem:[%s5099_s19 + $0x10] sm:$0xff] }
 0x157   : > { %729 = vmax.xlane.f32.xlu0 %v5136_v15  ;;  %786 = vadd.xlane.f32.xlu1 %v785_v16  ;;  %v854_v55 = vmul.f32 1.442695, %v842_v53  ;;  %v673_v16 = vld [vmem:[%s5099_s19 + $0x18] sm:$0xff]  ;;  %v920_v21 = vsel %vm910_vm1, %v672_v14, -inf }
 0x158   : > { %v994_v26 = vrot.slane %v993_v22, 2  ;;  %3973 = vmatpush3.msra.mxu0 %v1012_v33 }
 0x159   : > { %3974 = vmatprep.subr.mxu0 %v1011_v34 }
 0x15a   : > { %v995_v28 = vadd.f32 %v994_v26, %v993_v22  ;;  %3975 = vmatpush3.msra.mxu0 %v1011_v34  ;;  %v921_v22 = vsel %vm910_vm1, %v673_v16, -inf }
 0x15b   : > { %741 = vmax.xlane.f32.xlu0 %v5149_v23  ;;  %732 = vmax.xlane.f32.xlu1 %v5153_v24  ;;  %v922_v25 = vmax.f32 %v920_v21, %v921_v22 }
 0x15c   : > { %v996_v30 = vrot.slane %v995_v28, 1 }
 0x15d   : > { %v923_v26 = vrot.slane %v922_v25, 4 }
 0x15e   : > { %v997_v31 = vadd.f32 %v996_v30, %v995_v28  ;;  %v676_v28 = vld [vmem:[%s5099_s19 + $0x30] sm:$0xff]  ;;  %v677_v30 = vld [vmem:[%s5099_s19 + $0x38] sm:$0xff] }
 0x15f   : > { %744 = vmax.xlane.f32.xlu1 %v5162_v29  ;;  %v938_v33 = vsel %vm910_vm1, %v676_v28, -inf  ;;  %v939_v34 = vsel %vm910_vm1, %v677_v30, -inf }
 0x160   : > { %4335 = vrcp.f32 %v997_v31  ;;  %v940_v38 = vmax.f32 %v938_v33, %v939_v34 }
 0x161   : > { %4337 = vpow2.f32 %v846_v52 }
 0x162   : > { %4339 = vpow2.f32 %v848_v7  ;;  %v941_v40 = vrot.slane %v940_v38, 4 }
 0x163   : > { %4341 = vpow2.f32 %v854_v55 }
 0x164   : > { %4343 = vpow2.f32 %v856_v9  ;;  %v942_v45 = vmax.f32 %v940_v38, %v941_v40 }
 0x166   : > { %v943_v47 = vrot.slane %v942_v45, 2 }
 0x168   : > { %v944_v52 = vmax.f32 %v942_v45, %v943_v47 }
 0x16a   : > { %v945_v54 = vrot.slane %v944_v52, 1 }
 0x16d   : > { %v4336_v35 = vpop.eup %4335 }
 0x16e   : > { %v5165_v36 = vmul.f32 %v4336_v35, %v4328_v62  ;;  %v5167_v37 = vmul.f32 %v4336_v35, %v4326_v61  ;;  %v5178_v56 = vpop.eup %4337  ;;  %v924_v35 = vmax.f32 %v922_v25, %v923_v26 }
 0x16f   : > { %v5180_v0 = vpop.eup %4339  ;;  %v862_v1 = vsel %vm721_vm0, %v5178_v56, 0.0 }
 0x170   : > { %3986 = vmatprep.subr.mxu0 %v5165_v36  ;;  %v5182_v59 = vpop.eup %4341  ;;  %v863_v2 = vsel %vm721_vm0, %v5180_v0, 0.0  ;;  %v925_v39 = vrot.slane %v924_v35, 2 }
 0x171   : > { %v5188_v6 = vpop.eup %4343  ;;  %v864_v60 = vadd.f32 %v863_v2, %v862_v1  ;;  %v880_v61 = vsel %vm721_vm0, %v5182_v59, 0.0 }
 0x172   : > { %v881_v62 = vsel %vm721_vm0, %v5188_v6, 0.0  ;;  %v926_v44 = vmax.f32 %v924_v35, %v925_v39 }
 0x173   : > { %v865_v63 = vrot.slane %v864_v60, 4  ;;  %v882_v3 = vadd.f32 %v881_v62, %v880_v61  ;;  %v946_v61 = vmax.f32 %v944_v52, %v945_v54  ;;  %v5260_v52 = vld [vmem:[#allocation10 + $0x70] sm:$0xff] }
 0x174   : > { %v927_v46 = vrot.slane %v926_v44, 1 }
 0x175   : > { %v883_v4 = vrot.slane %v882_v3, 4  ;;  %v866_v10 = vadd.f32 %v865_v63, %v864_v60 }
 0x176   : > { %v928_v51 = vmax.f32 %v926_v44, %v927_v46 }
 0x177   : > { %v867_v12 = vrot.slane %v866_v10, 2  ;;  %v884_v13 = vadd.f32 %v883_v4, %v882_v3  ;;  %v953_v4 = vsub.f32 %v676_v28, %v946_v61 }
 0x178   : > { %v949_v53 = vsub.f32 %v672_v14, %v928_v51  ;;  %v950_v7 = vsub.f32 %v673_v16, %v928_v51  ;;  %v658_v51 = vld [vmem:[%s5241_s15] sm:$0xff] }
 0x179   : > { %v868_v17 = vadd.f32 %v867_v12, %v866_v10  ;;  %v885_v18 = vrot.slane %v884_v13, 2  ;;  %v954_v10 = vsub.f32 %v677_v30, %v946_v61  ;;  %v967_v16 = vmul.f32 1.442695, %v953_v4  ;;  %v5274_v61 = vld [vmem:[#allocation10 + $0x60] sm:$0xff] }
 0x17a   : > { %v959_v2 = vmul.f32 1.442695, %v949_v53  ;;  %v961_v60 = vmul.f32 1.442695, %v950_v7 }
 0x17b   : > { %v869_v31 = vrot.slane %v868_v17, 1  ;;  %v886_v32 = vadd.f32 %v885_v18, %v884_v13  ;;  %v969_v22 = vmul.f32 1.442695, %v954_v10 }
 0x17d   : > { %v870_v42 = vadd.f32 %v869_v31, %v868_v17  ;;  %v887_v43 = vrot.slane %v886_v32, 1 }
 0x17f   : > { %v888_v50 = vadd.f32 %v887_v43, %v886_v32 }
 0x1d8   : > { %v772_v41 = vpop.xlane.xlu0 %771 }
 0x1d9   : > { %4345 = vrcp.f32 %v772_v41 }
 0x1da   : > { %4347 = vrcp.f32 %v870_v42 }
 0x1dc   : > { %v775_v48 = vpop.xlane.xlu1 %774  ;;  %v784_v49 = vpop.xlane.xlu0 %783 }
 0x1dd   : > { %4349 = vrcp.f32 %v775_v48 }
 0x1de   : > { %4351 = vrcp.f32 %v784_v49 }
 0x1df   : > { %4353 = vrcp.f32 %v888_v50 }
 0x1e0   : > { %v787_v55 = vpop.xlane.xlu1 %786  ;;  %v730_v9 = vpop.xlane.xlu0 %729 }
 0x1e1   : > { %4355 = vrcp.f32 %v787_v55  ;;  %v748_v1 = vsub.f32 %v5127_v8, %v730_v9 }
 0x1e2   : > { %4357 = vpow2.f32 %v959_v2 }
 0x1e3   : > { %v758_v62 = vmul.f32 1.442695, %v748_v1  ;;  %4359 = vpow2.f32 %v961_v60  ;;  %v5270_v1 = vld [vmem:[#allocation10 + $0x68] sm:$0xff] }
 0x1e4   : > { %v733_v63 = vpop.xlane.xlu1 %732  ;;  %v742_v3 = vpop.xlane.xlu0 %741 }
 0x1e5   : > { %4361 = vpow2.f32 %v758_v62  ;;  %v749_v12 = vsub.f32 %v5144_v20, %v733_v63  ;;  %v752_v13 = vsub.f32 %v5141_v19, %v742_v3  ;;  %v5278_v3 = vld [vmem:[#allocation10 + $0x58] sm:$0xff] }
 0x1e6   : > { %v4346_v14 = vpop.eup %4345  ;;  %4363 = vpow2.f32 %v967_v16 }
 0x1e7   : > { %v760_v17 = vmul.f32 1.442695, %v749_v12  ;;  %v766_v18 = vmul.f32 1.442695, %v752_v13  ;;  %v802_v21 = vmul.f32 %v4346_v14, %v5115_v57  ;;  %v4348_v26 = vpop.eup %4347  ;;  %v5282_v12 = vld [vmem:[#allocation10 + $0x50] sm:$0xff]  ;;  %v5286_v14 = vld [vmem:[#allocation10 + $0x48] sm:$0xff] }
 0x1e8   : > { %v745_v25 = vpop.xlane.xlu1 %744  ;;  %v903_v57 = vmul.f32 %v4348_v26, %v5180_v0 }
 0x1e9   : > { %4365 = vpow2.f32 %v760_v17  ;;  %v753_v31 = vsub.f32 %v5156_v27, %v745_v25  ;;  %3976 = vmatprep.mubr.msk.f32.mxu0 %vm721_vm0, %v802_v21  ;;  %v5290_v17 = vld [vmem:[#allocation10 + $0x40] sm:$0xff]  ;;  %v5302_v25 = vld [vmem:[#allocation10 + $0x28] sm:$0xff] }
 0x1ea   : > { %v4350_v28 = vpop.eup %4349  ;;  %4367 = vpow2.f32 %v766_v18 }
 0x1eb   : > { %v4352_v30 = vpop.eup %4351  ;;  %v768_v32 = vmul.f32 1.442695, %v753_v31  ;;  %v803_v33 = vmul.f32 %v4350_v28, %v5124_v5  ;;  %4369 = vpow2.f32 %v969_v22  ;;  %v902_v5 = vmul.f32 %v4348_v26, %v5178_v56  ;;  %v5298_v22 = vld [vmem:[#allocation10 + $0x30] sm:$0xff]  ;;  %v5306_v26 = vld [vmem:[#allocation10 + $0x20] sm:$0xff]  ;;  %v5310_v28 = vld [vmem:[#allocation10 + $0x18] sm:$0xff] }
 0x1ec   : > { %v806_v34 = vmul.f32 %v4352_v30, %v5117_v58  ;;  %v4354_v35 = vpop.eup %4353 }
 0x1ed   : > { %4371 = vpow2.f32 %v768_v32  ;;  %3977 = vmatmul.mubr.msk.f32.vlgmr.msra.gmra.mxu0 %vm721_vm0, %v803_v33  ;;  %v906_v56 = vmul.f32 %v4354_v35, %v5182_v59  ;;  %v5246_v59 = vld [vmem:[#allocation10 + $0x78] sm:$0xff] }
 0x1ee   : > { %v4356_v38 = vpop.eup %4355  ;;  %3987 = vmatpush3.msra.mxu0 %v5165_v36  ;;  %3990 = vmatprep.mubr.msk.f32.mxu0 %vm721_vm0, %v806_v34  ;;  %v907_v36 = vmul.f32 %v4354_v35, %v5188_v6 }
 0x1ef   : > { %3988 = vmatprep.subr.mxu0 %v5167_v37  ;;  %v807_v39 = vmul.f32 %v4356_v38, %v5130_v11  ;;  %v5217_v40 = vpop.eup %4357 }
 0x1f0   : > { %3989 = vmatpush3.msra.mxu0 %v5167_v37  ;;  %v5220_v58 = vpop.eup %4359  ;;  %v980_v0 = vsel %vm910_vm1, %v5217_v40, 0.0 }
 0x1f1   : > { %4000 = vmatprep.subr.mxu0 %v903_v57  ;;  %3991 = vmatmul.mubr.msk.f32.vlgmr.msra.gmra.mxu0 %vm721_vm0, %v807_v39  ;;  %v981_v11 = vsel %vm910_vm1, %v5220_v58, 0.0 }
 0x1f2   : > { %v5226_v41 = vpop.eup %4361  ;;  %4001 = vmatpush3.msra.mxu0 %v903_v57  ;;  %4004 = vmatprep.mubr.msk.f32.mxu0 %vm721_vm0, %v802_v21  ;;  %v982_v42 = vadd.f32 %v981_v11, %v980_v0  ;;  %v5294_v21 = vld [vmem:[#allocation10 + $0x38] sm:$0xff]  ;;  %v5324_v57 = vld [vmem:[#allocation10] sm:$0xff] }
 0x1f3   : > { %4002 = vmatprep.subr.mxu0 %v902_v5  ;;  %v776_v37 = vsel %vm721_vm0, %v5226_v41, 0.0  ;;  %v5234_v6 = vpop.eup %4363  ;;  %v663_v0 = vld [vmem:[%s5241_s15 + $0x28] sm:$0xff]  ;;  %v664_v11 = vld [vmem:[%s5241_s15 + $0x30] sm:$0xff] }
 0x1f4   : > { %4003 = vmatpush3.msra.mxu0 %v902_v5  ;;  %777 = vadd.xlane.f32.xlu0 %v776_v37  ;;  %v983_v43 = vrot.slane %v982_v42, 4  ;;  %v998_v48 = vsel %vm910_vm1, %v5234_v6, 0.0  ;;  %v659_v5 = vld [vmem:[%s5241_s15 + $0x8] sm:$0xff]  ;;  %v665_v37 = vld [vmem:[%s5241_s15 + $0x38] sm:$0xff] }
 0x1f5   : > { %4014 = vmatprep.subr.mxu0 %v907_v36  ;;  %4005 = vmatmul.mubr.msk.f32.vlgmr.msra.gmra.mxu0 %vm721_vm0, %v803_v33  ;;  %v5316_v33 = vld [vmem:[#allocation10 + $0x10] sm:$0xff] }
 0x1f6   : > { %v5243_v44 = vpop.eup %4365  ;;  %4015 = vmatpush3.msra.mxu0 %v907_v36  ;;  %4018 = vmatprep.mubr.msk.f32.mxu0 %vm721_vm0, %v806_v34  ;;  %v984_v47 = vadd.f32 %v983_v43, %v982_v42  ;;  %v5320_v34 = vld [vmem:[#allocation10 + $0x8] sm:$0xff]  ;;  %v662_v36 = vld [vmem:[%s5241_s15 + $0x20] sm:$0xff]  ;;  %v5364_v42 = vld [vmem:[%s635_s4 + $0x8] sm:$0xff] }
 0x1f7   : > { %v5248_v45 = vpop.eup %4367  ;;  %4016 = vmatprep.subr.mxu0 %v906_v56  ;;  %v779_v46 = vsel %vm721_vm0, %v5243_v44, 0.0  ;;  %v5374_v43 = vld [vmem:[%s635_s4 + $0x18] sm:$0xff] }
 0x1f8   : > { %v5254_v49 = vpop.eup %4369  ;;  %4017 = vmatpush3.msra.mxu0 %v906_v56  ;;  %780 = vadd.xlane.f32.xlu1 %v779_v46  ;;  %v788_v50 = vsel %vm721_vm0, %v5248_v45, 0.0  ;;  %v985_v53 = vrot.slane %v984_v47, 2  ;;  %v5358_v56 = vld [vmem:[%s635_s4] sm:$0xff] }
 0x1f9   : > { %789 = vadd.xlane.f32.xlu0 %v788_v50  ;;  %4028 = vmatprep.subr.mxu0 %v5246_v59  ;;  %v999_v7 = vsel %vm910_vm1, %v5254_v49, 0.0 }
 0x1fa   : > { %v5264_v54 = vpop.eup %4371  ;;  %4019 = vmatmul.mubr.msk.f32.vlgmr.msra.gmra.mxu0 %vm721_vm0, %v807_v39  ;;  %v1000_v55 = vadd.f32 %v999_v7, %v998_v48  ;;  %v986_v2 = vadd.f32 %v985_v53, %v984_v47  ;;  %v831_v47 = vmax.f32 %v5149_v23, %v5162_v29 }
 0x1fb   : > { %4029 = vmatpush3.msra.mxu0 %v5246_v59  ;;  %v791_v9 = vsel %vm721_vm0, %v5264_v54, 0.0  ;;  %4060 = vmatprep.mubr.f32.mxu0 %v658_v51 }
 0x1fc   : > { %4030 = vmatprep.subr.mxu0 %v5260_v52  ;;  %792 = vadd.xlane.f32.xlu1 %v791_v9  ;;  %v1001_v60 = vrot.slane %v1000_v55, 4  ;;  %v987_v62 = vrot.slane %v986_v2, 1 }
 0x1fd   : > { %4031 = vmatpush3.msra.mxu0 %v5260_v52 }
 0x1fe   : > { %4032 = vmatprep.subr.mxu0 %v5270_v1  ;;  %v1002_v63 = vadd.f32 %v1001_v60, %v1000_v55  ;;  %v988_v4 = vadd.f32 %v987_v62, %v986_v2 }
 0x1ff   : > { %4033 = vmatpush3.msra.mxu0 %v5270_v1 }
 0x200   : > { %4034 = vmatprep.subr.mxu0 %v5274_v61  ;;  %v1003_v10 = vrot.slane %v1002_v63, 2  ;;  %4373 = vrcp.f32 %v988_v4 }
 0x201   : > { %4035 = vmatpush3.msra.mxu0 %v5274_v61 }
 0x202   : > { %4036 = vmatprep.subr.mxu0 %v5278_v3  ;;  %v1004_v13 = vadd.f32 %v1003_v10, %v1002_v63 }
 0x203   : > { %4037 = vmatpush3.msra.mxu0 %v5278_v3 }
 0x204   : > { %4038 = vmatprep.subr.mxu0 %v5282_v12  ;;  %v1005_v16 = vrot.slane %v1004_v13, 1 }
 0x205   : > { %4039 = vmatpush3.msra.mxu0 %v5282_v12 }
 0x206   : > { %4040 = vmatprep.subr.mxu0 %v5286_v14  ;;  %v1006_v18 = vadd.f32 %v1005_v16, %v1004_v13 }
 0x207   : > { %4041 = vmatpush3.msra.mxu0 %v5286_v14 }
 0x208   : > { %4042 = vmatprep.subr.mxu0 %v5290_v17  ;;  %4375 = vrcp.f32 %v1006_v18 }
 0x209   : > { %4043 = vmatpush3.msra.mxu0 %v5290_v17 }
 0x20a   : > { %4044 = vmatprep.subr.mxu0 %v5294_v21 }
 0x20b   : > { %4045 = vmatpush3.msra.mxu0 %v5294_v21 }
 0x20c   : > { %4046 = vmatprep.subr.mxu0 %v5298_v22 }
 0x20d   : > { %4047 = vmatpush3.msra.mxu0 %v5298_v22  ;;  %v4374_v31 = vpop.eup %4373 }
 0x20e   : > { %4048 = vmatprep.subr.mxu0 %v5302_v25  ;;  %v1014_v30 = vmul.f32 %v4374_v31, %v5220_v58  ;;  %v1013_v32 = vmul.f32 %v4374_v31, %v5217_v40  ;;  %v660_v40 = vld [vmem:[%s5241_s15 + $0x10] sm:$0xff]  ;;  %v661_v58 = vld [vmem:[%s5241_s15 + $0x18] sm:$0xff]  ;;  %s3483_s15 = sshll.u32 %s5633_s14, 4  ;;  %s5694_s15 = int_to_ptr.vmem [resolvable:$true] %s3483_s15 }
 0x20f   : > { %4049 = vmatpush3.msra.mxu0 %v5302_v25  ;;  %s4612_s20 = scalar_lea.vmem %s5694_s15, 1024 }
 0x210   : > { %4050 = vmatprep.subr.mxu0 %v5306_v26  ;;  %3979 = vmatprep.subr.mxu1 %v1014_v30  ;;  %p4613_p0 = scmp.ne.s32.totalorder %s5694_s15, %s4612_s20 }
 0x211   : > { %4051 = vmatpush3.msra.mxu0 %v5306_v26  ;;  %3980 = vmatpush3.msra.mxu1 %v1014_v30 }
 0x212   : > { %4052 = vmatprep.subr.mxu0 %v5310_v28  ;;  %3981 = vmatprep.subr.mxu1 %v1013_v32  ;;  %p4614_p3 = pnand %p4613_p0, %p5854_p7 }
 0x213   : > { %4053 = vmatpush3.msra.mxu0 %v5310_v28  ;;  %3982 = vmatpush3.msra.mxu1 %v1013_v32 }
 0x214   : > { %4054 = vmatprep.subr.mxu0 %v5316_v33  ;;  %p4615_p8 = pneg %p4614_p3 }
 0x215   : > { %v4376_v35 = vpop.eup %4375  ;;  %4055 = vmatpush3.msra.mxu0 %v5316_v33 }
 0x216   : > { %4056 = vmatprep.subr.mxu0 %v5320_v34  ;;  %v5328_v38 = vmul.f32 %v4376_v35, %v5254_v49  ;;  %v5331_v39 = vmul.f32 %v4376_v35, %v5234_v6  ;;  %v5367_v6 = vld [vmem:[%s635_s4 + $0x10] sm:$0xff]  ;;  %s4616_s4 = sshll.u32 %s4731_s0, 4  ;;  %s4617_s4 = int_to_ptr.vmem [resolvable:$false] %s4616_s4 }
 0x217   : > { %4057 = vmatpush3.msra.mxu0 %v5320_v34  ;;  %s4618_s10 = scalar_lea.vmem %s4617_s4, 2048  ;;  %p4619_p9 = scmp.lt.s32.totalorder %s5694_s15, %s4617_s4 }
 0x218   : > { %4058 = vmatprep.subr.mxu0 %v5324_v57  ;;  %3993 = vmatprep.subr.mxu1 %v5328_v38  ;;  %p4620_p10 = scmp.lt.s32.totalorder %s4618_s10, %s4612_s20 }
 0x219   : > { %4059 = vmatpush3.msra.mxu0 %v5324_v57 }
 0x21a   : > { %4061 = vmatmul.mubr.f32.vlgmr.msra.gmra.mxu0 %v659_v5  ;;  %4118 = vmatprep.subr.mxu0 %v5246_v59  ;;  %p4621_p13 = por %p4620_p10, %p4619_p9 }
 0x21b   : > { %4063 = vmatprep.mubr.f32.mxu0 %v660_v40  ;;  %4119 = vmatpush3.msra.mxu0 %v5246_v59  ;;  %v817_v59 = vmax.f32 %v5136_v15, %v5153_v24  ;;  %v832_v24 = vrot.slane %v831_v47, 4 }
 0x21c   : > { %4120 = vmatprep.subr.mxu0 %v5260_v52  ;;  %p4622_p11 = pnand %p4621_p13, %p4615_p8 }
 0x21d   : > { %4121 = vmatpush3.msra.mxu0 %v5260_v52  ;;  %v818_v46 = vrot.slane %v817_v59, 4  ;;  %v833_v23 = vmax.f32 %v831_v47, %v832_v24 }
 0x21e   : > { %4064 = vmatmul.mubr.f32.gmra.mxu0 %v661_v58  ;;  %4122 = vmatprep.subr.mxu0 %v5270_v1 }
 0x21f   : > { %4066 = vmatprep.mubr.f32.mxu0 %v662_v36  ;;  %4123 = vmatpush3.msra.mxu0 %v5270_v1  ;;  %v819_v15 = vmax.f32 %v817_v59, %v818_v46  ;;  %v834_v49 = vrot.slane %v833_v23, 2 }
 0x220   : > { %4124 = vmatprep.subr.mxu0 %v5274_v61 }
 0x221   : > { %4125 = vmatpush3.msra.mxu0 %v5274_v61  ;;  %v820_v48 = vrot.slane %v819_v15, 2  ;;  %v835_v51 = vmax.f32 %v833_v23, %v834_v49 }
 0x222   : > { %4067 = vmatmul.mubr.f32.gmra.mxu0 %v663_v0  ;;  %4126 = vmatprep.subr.mxu0 %v5278_v3 }
 0x223   : > { %4069 = vmatprep.mubr.f32.mxu0 %v664_v11  ;;  %4127 = vmatpush3.msra.mxu0 %v5278_v3  ;;  %v821_v29 = vmax.f32 %v819_v15, %v820_v48  ;;  %v836_v53 = vrot.slane %v835_v51, 1 }
 0x224   : > { %4128 = vmatprep.subr.mxu0 %v5282_v12 }
 0x225   : > { %4129 = vmatpush3.msra.mxu0 %v5282_v12  ;;  %v822_v50 = vrot.slane %v821_v29, 1  ;;  %v837_v55 = vmax.f32 %v835_v51, %v836_v53 }
 0x226   : > { %4070 = vmatmul.mubr.f32.gmra.mxu0 %v665_v37  ;;  %4130 = vmatprep.subr.mxu0 %v5286_v14 }
 0x227   : > { %4072 = vmatprep.mubr.f32.mxu0 %v5358_v56  ;;  %4131 = vmatpush3.msra.mxu0 %v5286_v14  ;;  %v823_v52 = vmax.f32 %v821_v29, %v822_v50  ;;  %v844_v2 = vsub.f32 %v5141_v19, %v837_v55  ;;  %v845_v61 = vsub.f32 %v5156_v27, %v837_v55 }
 0x228   : > { %4132 = vmatprep.subr.mxu0 %v5290_v17 }
 0x229   : > { %4133 = vmatpush3.msra.mxu0 %v5290_v17  ;;  %v840_v7 = vsub.f32 %v5127_v8, %v823_v52  ;;  %v841_v9 = vsub.f32 %v5144_v20, %v823_v52  ;;  %v858_v62 = vmul.f32 1.442695, %v844_v2  ;;  %v860_v63 = vmul.f32 1.442695, %v845_v61  ;;  %v5438_v52 = vld [vmem:[%s5782_s8] ss:$0 sm:$0xff] }
 0x22a   : > { %4073 = vmatmul.mubr.f32.gmra.mxu0 %v5364_v42  ;;  %4134 = vmatprep.subr.mxu0 %v5294_v21 }
 0x22b   : > { %4075 = vmatprep.mubr.f32.mxu0 %v5367_v6  ;;  %4135 = vmatpush3.msra.mxu0 %v5294_v21  ;;  %v850_v1 = vmul.f32 1.442695, %v840_v7  ;;  %v852_v60 = vmul.f32 1.442695, %v841_v9 }
 0x22c   : > { %4136 = vmatprep.subr.mxu0 %v5298_v22 }
 0x22d   : > { %4137 = vmatpush3.msra.mxu0 %v5298_v22  ;;  %4377 = vpow2.f32 %v850_v1 }
 0x22e   : > { %4076 = vmatmul.mubr.f32.gmra.mxu0 %v5374_v43  ;;  %4138 = vmatprep.subr.mxu0 %v5302_v25  ;;  %4379 = vpow2.f32 %v852_v60 }
 0x22f   : > { %4139 = vmatpush3.msra.mxu0 %v5302_v25  ;;  %4381 = vpow2.f32 %v858_v62 }
 0x230   : > { %4140 = vmatprep.subr.mxu0 %v5306_v26  ;;  %4383 = vpow2.f32 %v860_v63 }
 0x231   : > { %4141 = vmatpush3.msra.mxu0 %v5306_v26 }
 0x232   : > { %4142 = vmatprep.subr.mxu0 %v5310_v28 }
 0x233   : > { %4143 = vmatpush3.msra.mxu0 %v5310_v28 }
 0x234   : > { %4144 = vmatprep.subr.mxu0 %v5316_v33 }
 0x235   : > { %4145 = vmatpush3.msra.mxu0 %v5316_v33 }
 0x236   : > { %4146 = vmatprep.subr.mxu0 %v5320_v34 }
 0x237   : > { %4147 = vmatpush3.msra.mxu0 %v5320_v34 }
 0x238   : > { %4148 = vmatprep.subr.mxu0 %v5324_v57 }
 0x239   : > { %4149 = vmatpush3.msra.mxu0 %v5324_v57 }
 0x23a   : > { %v4378_v3 = vpop.eup %4377 }
 0x23b   : > { %v4380_v4 = vpop.eup %4379  ;;  %v871_v8 = vsel %vm721_vm0, %v4378_v3, 0.0 }
 0x23c   : > { %v4382_v10 = vpop.eup %4381  ;;  %v872_v12 = vsel %vm721_vm0, %v4380_v4, 0.0 }
 0x23d   : > { %v4384_v20 = vpop.eup %4383  ;;  %v873_v13 = vadd.f32 %v872_v12, %v871_v8  ;;  %v889_v19 = vsel %vm721_vm0, %v4382_v10, 0.0 }
 0x23e   : > { %v890_v14 = vsel %vm721_vm0, %v4384_v20, 0.0 }
 0x23f   : > { %v874_v27 = vrot.slane %v873_v13, 4  ;;  %v891_v16 = vadd.f32 %v890_v14, %v889_v19 }
 0x241   : > { %v892_v17 = vrot.slane %v891_v16, 4  ;;  %v875_v18 = vadd.f32 %v874_v27, %v873_v13 }
 0x243   : > { %v876_v21 = vrot.slane %v875_v18, 2  ;;  %v893_v22 = vadd.f32 %v892_v17, %v891_v16 }
 0x245   : > { %v877_v25 = vadd.f32 %v876_v21, %v875_v18  ;;  %v894_v26 = vrot.slane %v893_v22, 2 }
 0x247   : > { %v878_v31 = vrot.slane %v877_v25, 1  ;;  %v895_v28 = vadd.f32 %v894_v26, %v893_v22 }
 0x249   : > { %v879_v32 = vadd.f32 %v878_v31, %v877_v25  ;;  %v896_v33 = vrot.slane %v895_v28, 1 }
 0x24b   : > { %v897_v35 = vadd.f32 %v896_v33, %v895_v28 }
 0x27d   : > { %v778_v30 = vpop.xlane.xlu0 %777 }
 0x27e   : > { %4385 = vrcp.f32 %v778_v30 }
 0x27f   : > { %4387 = vrcp.f32 %v879_v32 }
 0x281   : > { %v781_v34 = vpop.xlane.xlu1 %780 }
 0x282   : > { %4389 = vrcp.f32 %v781_v34  ;;  %v790_v57 = vpop.xlane.xlu0 %789 }
 0x283   : > { %4391 = vrcp.f32 %v790_v57 }
 0x284   : > { %4393 = vrcp.f32 %v897_v35 }
 0x285   : > { %v793_v5 = vpop.xlane.xlu1 %792 }
 0x286   : > { %4395 = vrcp.f32 %v793_v5 }
 0x28b   : > { %v4386_v40 = vpop.eup %4385 }
 0x28c   : > { %v804_v58 = vmul.f32 %v4386_v40, %v5226_v41  ;;  %v4388_v36 = vpop.eup %4387 }
 0x28d   : > { %v905_v47 = vmul.f32 %v4388_v36, %v4380_v4  ;;  %v904_v24 = vmul.f32 %v4388_v36, %v4378_v3 }
 0x28e   : > { %3983 = vmatprep.mubr.msk.f32.mxu1 %vm721_vm0, %v804_v58 }
 0x28f   : > { %v4390_v0 = vpop.eup %4389 }
 0x290   : > { %v4392_v11 = vpop.eup %4391  ;;  %v805_v37 = vmul.f32 %v4390_v0, %v5243_v44  ;;  %v2090_v0 = vlaneseq }
 0x291   : > { %v808_v59 = vmul.f32 %v4392_v11, %v5248_v45  ;;  %v4394_v46 = vpop.eup %4393  ;;  %v703_v11 = vld [vmem:[%s5042_s29] sm:$0x1] }
 0x292   : > { %3984 = vmatmul.mubr.msk.f32.vlgmr.msra.gmra.mxu1 %vm721_vm0, %v805_v37  ;;  %v909_v44 = vmul.f32 %v4394_v46, %v4384_v20  ;;  %v908_v45 = vmul.f32 %v4394_v46, %v4382_v10  ;;  %vm707_vm2 = vcmp.ne.s32.totalorder %v703_v11, 0  ;;  %v704_v46 = vld [vmem:[%s5042_s29 + $0x1] sm:$0x1] }
 0x293   : > { %v4396_v15 = vpop.eup %4395  ;;  %3994 = vmatpush3.msra.mxu1 %v5328_v38  ;;  %3997 = vmatprep.mubr.msk.f32.mxu1 %vm721_vm0, %v808_v59  ;;  %vm708_vm3 = vcmp.ne.s32.totalorder %v704_v46, 0 }
 0x294   : > { %3995 = vmatprep.subr.mxu1 %v5331_v39  ;;  %v809_v41 = vmul.f32 %v4396_v15, %v5264_v54  ;;  %v4730_v15 = vmov 0  }
 0x295   : > { %3996 = vmatpush3.msra.mxu1 %v5331_v39 }
 0x296   : > { %3998 = vmatmul.mubr.msk.f32.vlgmr.msra.gmra.mxu1 %vm721_vm0, %v809_v41  ;;  %4007 = vmatprep.subr.mxu1 %v905_v47 }
 0x297   : > { %4008 = vmatpush3.msra.mxu1 %v905_v47  ;;  %4011 = vmatprep.mubr.msk.f32.mxu1 %vm721_vm0, %v804_v58 }
 0x298   : > { %4009 = vmatprep.subr.mxu1 %v904_v24 }
 0x299   : > { %4010 = vmatpush3.msra.mxu1 %v904_v24  ;;  %v705_v24 = vld [vmem:[%s5042_s29 + $0x2] sm:$0x1] }
 0x29a   : > { %4012 = vmatmul.mubr.msk.f32.vlgmr.msra.gmra.mxu1 %vm721_vm0, %v805_v37  ;;  %4021 = vmatprep.subr.mxu1 %v909_v44  ;;  %vm709_vm4 = vcmp.ne.s32.totalorder %v705_v24, 0 }
 0x29b   : > { %4022 = vmatpush3.msra.mxu1 %v909_v44  ;;  %4025 = vmatprep.mubr.msk.f32.mxu1 %vm721_vm0, %v808_v59  ;;  %v2091_v59 = vshrl.u32 %v2090_v0, 7 }
 0x29c   : > { %4023 = vmatprep.subr.mxu1 %v908_v45 }
 0x29d   : > { %4024 = vmatpush3.msra.mxu1 %v908_v45  ;;  %v5469_v47 = vsub.s32 0, %v2091_v59 }
 0x29e   : > { %4026 = vmatmul.mubr.msk.f32.vlgmr.msra.gmra.mxu1 %vm721_vm0, %v809_v41  ;;  %v2086_v41 = vsel %vm707_vm2, 1, %v4730_v15 }
 0x29f   : > { %v2093_v45 = vrot.slane %v2086_v41, %v5469_v47 }
 0x2a1   : > { %vm2106_vm5 = vcmp.eq.s32.totalorder %v2093_v45, 1 }
 0x2ad   : > { %v5419_v54 = vpop.f32.mrf.mxu0 }
 0x2af   : > { %v5421_v38 = vpop.f32.mrf.mxu0 }
 0x2b1   : > { %v5423_v39 = vpop.f32.mrf.mxu0 }
 0x2b3   : > { %v5425_v48 = vpop.f32.mrf.mxu0 }
 0x2b5   : > { %v5427_v23 = vpop.f32.mrf.mxu0 }
 0x2b7   : > { %v5429_v29 = vpop.f32.mrf.mxu0 }
 0x2ba   : > { %v5431_v49 = vpop.f32.mrf.mxu0 }
 0x2bc   : > { %v5433_v50 = vpop.f32.mrf.mxu0 }
 0x2da   : > { %v4062_v51 = vpop.f32.mrf.mxu0 }
 0x2db   : > { %v1721_v12 = vadd.f32 %v4062_v51, %v5438_v52  ;;  %v2087_v51 = vsel %vm708_vm3, 1, %v4730_v15 }
 0x2dc   : > { %v1715_v53 = vpop.f32.mrf.mxu0 }
 0x2dd   : > { %v1716_v7 = vadd.f32 %v5438_v52, %v1715_v53  ;;  %v1775_v16 = vmax.f32 %v1721_v12, 0.0  ;;  %v706_v53 = vld [vmem:[%s5042_s29 + $0x3] sm:$0x1] }
 0x2de   : > { %v4065_v55 = vpop.f32.mrf.mxu0  ;;  %vm710_vm6 = vcmp.ne.s32.totalorder %v706_v53, 0 }
 0x2df   : > { %v1774_v9 = vmax.f32 %v1716_v7, 0.0  ;;  %v1731_v17 = vadd.f32 %v4065_v55, %v5438_v52  ;;  %v2097_v55 = vrot.slane %v2087_v51, %v5469_v47 }
 0x2e0   : > { %v1725_v1 = vpop.f32.mrf.mxu0 }
 0x2e1   : > { %4080 = vmatprep.mubr.f32.mxu1 %v1774_v9  ;;  %v1726_v13 = vadd.f32 %v5438_v52, %v1725_v1  ;;  %v1777_v26 = vmax.f32 %v1731_v17, 0.0  ;;  %v2088_v9 = vsel %vm709_vm4, 1, %v4730_v15  ;;  %vm2107_vm7 = vcmp.eq.s32.totalorder %v2097_v55, 1 }
 0x2e2   : > { %v4068_v2 = vpop.f32.mrf.mxu0 }
 0x2e3   : > { %v1776_v22 = vmax.f32 %v1726_v13, 0.0  ;;  %v1741_v31 = vadd.f32 %v4068_v2, %v5438_v52 }
 0x2e4   : > { %v1735_v60 = vpop.f32.mrf.mxu0 }
 0x2e5   : > { %v1736_v25 = vadd.f32 %v5438_v52, %v1735_v60  ;;  %v1779_v33 = vmax.f32 %v1741_v31, 0.0 }
 0x2e6   : > { %v4071_v61 = vpop.f32.mrf.mxu0 }
 0x2e7   : > { %v1778_v30 = vmax.f32 %v1736_v25, 0.0  ;;  %v1751_v34 = vadd.f32 %v4071_v61, %v5438_v52 }
 0x2e8   : > { %v1745_v62 = vpop.f32.mrf.mxu0 }
 0x2e9   : > { %v1746_v32 = vadd.f32 %v5438_v52, %v1745_v62  ;;  %v1781_v57 = vmax.f32 %v1751_v34, 0.0  ;;  %v2101_v62 = vrot.slane %v2088_v9, %v5469_v47 }
 0x2ea   : > { %v4074_v63 = vpop.f32.mrf.mxu0 }
 0x2eb   : > { %v1761_v4 = vadd.f32 %v4074_v63, %v5438_v52  ;;  %v1780_v35 = vmax.f32 %v1746_v32, 0.0  ;;  %vm2108_vm8 = vcmp.eq.s32.totalorder %v2101_v62, 1 }
 0x2ec   : > { %v1755_v3 = vpop.f32.mrf.mxu0 }
 0x2ed   : > { %v1756_v10 = vadd.f32 %v5438_v52, %v1755_v3  ;;  %v1783_v14 = vmax.f32 %v1761_v4, 0.0  ;;  %v2089_v3 = vsel %vm710_vm6, 1, %v4730_v15 }
 0x2ee   : > { %v4077_v8 = vpop.f32.mrf.mxu0  ;;  %v2105_v13 = vrot.slane %v2089_v3, %v5469_v47 }
 0x2ef   : > { %v1782_v20 = vmax.f32 %v1756_v10, 0.0  ;;  %v1771_v18 = vadd.f32 %v4077_v8, %v5438_v52 }
 0x2f0   : > { %v1765_v19 = vpop.f32.mrf.mxu0  ;;  %vm2109_vm9 = vcmp.eq.s32.totalorder %v2105_v13, 1 }
 0x2f1   : > { %4078 = vmatprep.subr.mxu1 %v1782_v20  ;;  %v1766_v27 = vadd.f32 %v5438_v52, %v1765_v19  ;;  %v1785_v28 = vmax.f32 %v1771_v18, 0.0 }
 0x2f2   : > { %4079 = vmatpush3.xpose.msra.mxu1 %v1782_v20 }
 0x2f3   : > { %4083 = vmatprep.subr.mxu1 %v1783_v14  ;;  %v1784_v21 = vmax.f32 %v1766_v27, 0.0 }
 0x2f5   : > { %4081 = vmatmul.mubr.f32.vlgmr.msra.gmra.mxu1 %v1775_v16 }
 0x2f6   : > { %4084 = vmatpush3.xpose.msra.mxu1 %v1783_v14  ;;  %4085 = vmatprep.mubr.f32.mxu1 %v1776_v22 }
 0x2f7   : > { %4088 = vmatprep.subr.mxu1 %v1784_v21 }
 0x2f9   : > { %4086 = vmatmul.mubr.f32.vlgmr.msra.gmra.mxu1 %v1777_v26 }
 0x2fa   : > { %4089 = vmatpush3.xpose.msra.mxu1 %v1784_v21  ;;  %4090 = vmatprep.mubr.f32.mxu1 %v1778_v30 }
 0x2fb   : > { %4093 = vmatprep.subr.mxu1 %v1785_v28 }
 0x2fd   : > { %4091 = vmatmul.mubr.f32.vlgmr.msra.gmra.mxu1 %v1779_v33 }
 0x2fe   : > { %4094 = vmatpush3.xpose.msra.mxu1 %v1785_v28  ;;  %4095 = vmatprep.mubr.f32.mxu1 %v1780_v35 }
 0x2ff   : > { %4098 = vmatprep.subr.mxu1 %v5358_v56 }
 0x301   : > { %4096 = vmatmul.mubr.f32.vlgmr.msra.gmra.mxu1 %v1781_v57 }
 0x302   : > { %4099 = vmatpush3.msra.mxu1 %v5358_v56 }
 0x303   : > { %4103 = vmatprep.subr.mxu1 %v5364_v42 }
 0x352   : > { %v5455_v5 = vpop.f32.mrf.mxu1 }
 0x354   : > { %v5457_v40 = vpop.f32.mrf.mxu1 }
 0x356   : > { %v5459_v58 = vpop.f32.mrf.mxu1 }
 0x358   : > { %v5461_v36 = vpop.f32.mrf.mxu1 }
 0x35a   : > { %v5464_v37 = vpop.f32.mrf.mxu1 }
 0x35c   : > { %v5467_v56 = vpop.f32.mrf.mxu1 }
 0x35e   : > { %v5473_v44 = vpop.f32.mrf.mxu1 }
 0x360   : > { %v5478_v7 = vpop.f32.mrf.mxu1 }
 0x3b5   : > { %v4082_v1 = vpop.f32.mrf.mxu1 }
 0x3b6   : > { %v2111_v2 = vsel %vm2106_vm5, -1e+30, %v4082_v1 }
 0x3b7   : > { %v1852_v60 = vpop.f32.mrf.mxu1  ;;  %v2121_v61 = vsel %vm910_vm1, %v2111_v2, -inf }
 0x3b8   : > { %v2110_v63 = vsel %vm2106_vm5, -1e+30, %v1852_v60  ;;  %2122 = vmax.xlane.f32.xlu1 %v2121_v61 }
 0x3b9   : > { %v4087_v4 = vpop.f32.mrf.mxu1  ;;  %v2118_v10 = vsel %vm910_vm1, %v2110_v63, -inf }
 0x3ba   : > { %v2113_v8 = vsel %vm2107_vm7, -1e+30, %v4087_v4  ;;  %2119 = vmax.xlane.f32.xlu0 %v2118_v10 }
 0x3bb   : > { %v1927_v12 = vpop.f32.mrf.mxu1  ;;  %v2127_v20 = vsel %vm910_vm1, %v2113_v8, -inf }
 0x3bc   : > { %v2112_v19 = vsel %vm2107_vm7, -1e+30, %v1927_v12  ;;  %2128 = vmax.xlane.f32.xlu1 %v2127_v20 }
 0x3bd   : > { %v4092_v14 = vpop.f32.mrf.mxu1  ;;  %v2124_v27 = vsel %vm910_vm1, %v2112_v19, -inf }
 0x3be   : > { %v2115_v16 = vsel %vm2108_vm8, -1e+30, %v4092_v14  ;;  %2125 = vmax.xlane.f32.xlu0 %v2124_v27 }
 0x3bf   : > { %v2002_v17 = vpop.f32.mrf.mxu1  ;;  %v2133_v18 = vsel %vm910_vm1, %v2115_v16, -inf }
 0x3c0   : > { %v2114_v21 = vsel %vm2108_vm8, -1e+30, %v2002_v17  ;;  %2134 = vmax.xlane.f32.xlu1 %v2133_v18 }
 0x3c1   : > { %v4097_v22 = vpop.f32.mrf.mxu1  ;;  %v2130_v25 = vsel %vm910_vm1, %v2114_v21, -inf }
 0x3c2   : > { %v2117_v26 = vsel %vm2109_vm9, -1e+30, %v4097_v22  ;;  %2131 = vmax.xlane.f32.xlu0 %v2130_v25 }
 0x3c3   : > { %v2077_v31 = vpop.f32.mrf.mxu1  ;;  %v2139_v28 = vsel %vm910_vm1, %v2117_v26, -inf }
 0x3c4   : > { %v2116_v30 = vsel %vm2109_vm9, -1e+30, %v2077_v31  ;;  %2140 = vmax.xlane.f32.xlu1 %v2139_v28 }
 0x3c5   : > { %v2136_v32 = vsel %vm910_vm1, %v2116_v30, -inf }
 0x3c6   : > { %2137 = vmax.xlane.f32.xlu0 %v2136_v32 }
 0x441   : > { %v2123_v33 = vpop.xlane.xlu1 %2122 }
 0x442   : > { %v2143_v34 = vsub.f32 %v2111_v2, %v2123_v33 }
 0x443   : > { %v2120_v35 = vpop.xlane.xlu0 %2119 }
 0x444   : > { %v2152_v57 = vmul.f32 1.442695, %v2143_v34  ;;  %v2142_v0 = vsub.f32 %v2110_v63, %v2120_v35 }
 0x445   : > { %v2129_v11 = vpop.xlane.xlu1 %2128 }
 0x446   : > { %4397 = vpow2.f32 %v2152_v57  ;;  %v2150_v59 = vmul.f32 1.442695, %v2142_v0  ;;  %v2145_v46 = vsub.f32 %v2113_v8, %v2129_v11  ;;  %v2206_v0 = vstv %s656_s12 }
 0x447   : > { %v2126_v41 = vpop.xlane.xlu0 %2125 }
 0x448   : > { %4399 = vpow2.f32 %v2150_v59  ;;  %v2156_v24 = vmul.f32 1.442695, %v2145_v46  ;;  %v2144_v45 = vsub.f32 %v2112_v19, %v2126_v41  ;;  %v2208_v41 = vmul.f32 %v5419_v54, %v2206_v0 }
 0x449   : > { %v2135_v51 = vpop.xlane.xlu1 %2134 }
 0x44a   : > { %4401 = vpow2.f32 %v2156_v24  ;;  %v2154_v53 = vmul.f32 1.442695, %v2144_v45  ;;  %v2147_v55 = vsub.f32 %v2115_v16, %v2135_v51  ;;  %v2207_v51 = vmul.f32 %v2206_v0, %v5421_v38 }
 0x44b   : > { %v2132_v9 = vpop.xlane.xlu0 %2131 }
 0x44c   : > { %4403 = vpow2.f32 %v2154_v53  ;;  %v2160_v1 = vmul.f32 1.442695, %v2147_v55  ;;  %v2146_v60 = vsub.f32 %v2114_v21, %v2132_v9 }
 0x44d   : > { %v2141_v2 = vpop.xlane.xlu1 %2140 }
 0x44e   : > { %4405 = vpow2.f32 %v2160_v1  ;;  %v2158_v61 = vmul.f32 1.442695, %v2146_v60  ;;  %v2149_v62 = vsub.f32 %v2117_v26, %v2141_v2  ;;  %v2210_v1 = vmul.f32 %v5455_v5, %v2206_v0 }
 0x44f   : > { %v2138_v63 = vpop.xlane.xlu0 %2137 }
 0x450   : > { %4407 = vpow2.f32 %v2158_v61  ;;  %v2164_v3 = vmul.f32 1.442695, %v2149_v62  ;;  %v2148_v4 = vsub.f32 %v2116_v30, %v2138_v63  ;;  %v2209_v61 = vmul.f32 %v2206_v0, %v5457_v40 }
 0x451   : > { %v2212_v63 = vmul.f32 %v5423_v39, %v2206_v0 }
 0x452   : > { %4409 = vpow2.f32 %v2164_v3  ;;  %v2162_v10 = vmul.f32 1.442695, %v2148_v4 }
 0x453   : > { %v4398_v8 = vpop.eup %4397 }
 0x454   : > { %4411 = vpow2.f32 %v2162_v10  ;;  %v2169_v12 = vsel %vm910_vm1, %v4398_v8, 0.0 }
 0x455   : > { %v4400_v20 = vpop.eup %4399  ;;  %2170 = vadd.xlane.f32.xlu1 %v2169_v12  ;;  %v2214_v12 = vmul.f32 %v5459_v58, %v2206_v0 }
 0x456   : > { %v2166_v13 = vsel %vm910_vm1, %v4400_v20, 0.0 }
 0x457   : > { %v4402_v19 = vpop.eup %4401  ;;  %2167 = vadd.xlane.f32.xlu0 %v2166_v13 }
 0x458   : > { %v2175_v14 = vsel %vm910_vm1, %v4402_v19, 0.0 }
 0x459   : > { %v4404_v27 = vpop.eup %4403  ;;  %2176 = vadd.xlane.f32.xlu1 %v2175_v14 }
 0x45a   : > { %v2172_v16 = vsel %vm910_vm1, %v4404_v27, 0.0 }
 0x45b   : > { %v4406_v17 = vpop.eup %4405  ;;  %2173 = vadd.xlane.f32.xlu0 %v2172_v16 }
 0x45c   : > { %v2181_v18 = vsel %vm910_vm1, %v4406_v17, 0.0 }
 0x45d   : > { %v4408_v21 = vpop.eup %4407  ;;  %2182 = vadd.xlane.f32.xlu1 %v2181_v18 }
 0x45e   : > { %v2178_v22 = vsel %vm910_vm1, %v4408_v21, 0.0 }
 0x45f   : > { %v5499_v25 = vpop.eup %4409  ;;  %2179 = vadd.xlane.f32.xlu0 %v2178_v22 }
 0x460   : > { %v2187_v26 = vsel %vm910_vm1, %v5499_v25, 0.0 }
 0x461   : > { %v5503_v31 = vpop.eup %4411  ;;  %2188 = vadd.xlane.f32.xlu1 %v2187_v26 }
 0x462   : > { %v2184_v28 = vsel %vm910_vm1, %v5503_v31, 0.0 }
 0x463   : > { %2185 = vadd.xlane.f32.xlu0 %v2184_v28 }
 0x4de   : > { %v2171_v30 = vpop.xlane.xlu1 %2170 }
 0x4df   : > { %4413 = vrcp.f32 %v2171_v30 }
 0x4e0   : > { %v2168_v32 = vpop.xlane.xlu0 %2167 }
 0x4e1   : > { %4415 = vrcp.f32 %v2168_v32 }
 0x4e2   : > { %v2177_v33 = vpop.xlane.xlu1 %2176 }
 0x4e3   : > { %4417 = vrcp.f32 %v2177_v33 }
 0x4e4   : > { %v2174_v34 = vpop.xlane.xlu0 %2173 }
 0x4e5   : > { %4419 = vrcp.f32 %v2174_v34 }
 0x4e6   : > { %v2183_v35 = vpop.xlane.xlu1 %2182 }
 0x4e7   : > { %4421 = vrcp.f32 %v2183_v35 }
 0x4e8   : > { %v2180_v57 = vpop.xlane.xlu0 %2179 }
 0x4e9   : > { %4423 = vrcp.f32 %v2180_v57 }
 0x4ea   : > { %v2189_v11 = vpop.xlane.xlu1 %2188 }
 0x4eb   : > { %4425 = vrcp.f32 %v2189_v11 }
 0x4ec   : > { %v4414_v59 = vpop.eup %4413  ;;  %v2186_v46 = vpop.xlane.xlu0 %2185 }
 0x4ed   : > { %4427 = vrcp.f32 %v2186_v46  ;;  %v2199_v24 = vmul.f32 %v4414_v59, %v4398_v8 }
 0x4ee   : > { %v4416_v45 = vpop.eup %4415 }
 0x4ef   : > { %v2198_v53 = vmul.f32 %v4416_v45, %v4400_v20  ;;  %v2216_v55 = vadd.f32 %v2208_v41, %v2199_v24 }
 0x4f0   : > { %v4418_v9 = vpop.eup %4417 }
 0x4f1   : > { %v2215_v60 = vadd.f32 %v2207_v51, %v2198_v53  ;;  %4100 = vmatprep.mubr.msk.f32.mxu1 %vm910_vm1, %v2198_v53  ;;  %2224 = vst.msk [vmem:[%s5512_s11 + $0x8] sm:$0xff] %vm910_vm1, %v2216_v55  ;;  %v2201_v54 = vmul.f32 %v4418_v9, %v4402_v19 }
 0x4f2   : > { %v4420_v2 = vpop.eup %4419  ;;  %4101 = vmatmul.mubr.msk.f32.vlgmr.msra.gmra.mxu1 %vm910_vm1, %v2199_v24 }
 0x4f3   : > { %2223 = vst.msk [vmem:[%s5512_s11] sm:$0xff] %vm910_vm1, %v2215_v60  ;;  %4104 = vmatpush3.msra.mxu1 %v5364_v42  ;;  %v2200_v38 = vmul.f32 %v4420_v2, %v4404_v27  ;;  %v2218_v62 = vadd.f32 %v2210_v1, %v2201_v54  ;;  %v2211_v42 = vmul.f32 %v2206_v0, %v5425_v48 }
 0x4f4   : > { %v4422_v5 = vpop.eup %4421  ;;  %4108 = vmatprep.subr.mxu1 %v5367_v6 }
 0x4f5   : > { %v2217_v3 = vadd.f32 %v2209_v61, %v2200_v38  ;;  %4105 = vmatprep.mubr.msk.f32.mxu1 %vm910_vm1, %v2200_v38  ;;  %2226 = vst.msk [vmem:[%s5512_s11 + $0x18] sm:$0xff] %vm910_vm1, %v2218_v62  ;;  %v2203_v4 = vmul.f32 %v4422_v5, %v4406_v17  ;;  %v712_v61 = vld [vmem:[%s5049_s18 + $0x1] sm:$0x1] }
 0x4f6   : > { %v4424_v10 = vpop.eup %4423  ;;  %4106 = vmatmul.mubr.msk.f32.vlgmr.msra.gmra.mxu1 %vm910_vm1, %v2201_v54  ;;  %vm716_vm11 = vcmp.ne.s32.totalorder %v712_v61, 0 }
 0x4f7   : > { %2225 = vst.msk [vmem:[%s5512_s11 + $0x10] sm:$0xff] %vm910_vm1, %v2217_v3  ;;  %4109 = vmatpush3.msra.mxu1 %v5367_v6  ;;  %v2202_v40 = vmul.f32 %v4424_v10, %v4408_v21  ;;  %v2220_v8 = vadd.f32 %v2212_v63, %v2203_v4  ;;  %v2213_v6 = vmul.f32 %v2206_v0, %v5461_v36  ;;  %v2969_v62 = vsel %vm716_vm11, 1, %v4730_v15 }
 0x4f8   : > { %v4426_v39 = vpop.eup %4425  ;;  %4113 = vmatprep.subr.mxu1 %v5374_v43  ;;  %v2979_v10 = vrot.slane %v2969_v62, %v5469_v47 }
 0x4f9   : > { %v2219_v20 = vadd.f32 %v2211_v42, %v2202_v40  ;;  %4110 = vmatprep.mubr.msk.f32.mxu1 %vm910_vm1, %v2202_v40  ;;  %2228 = vst.msk [vmem:[%s5512_s11 + $0x28] sm:$0xff] %vm910_vm1, %v2220_v8  ;;  %v2205_v48 = vmul.f32 %v4426_v39, %v5499_v25  ;;  %v713_v8 = vld [vmem:[%s5049_s18 + $0x2] sm:$0x1] }
 0x4fa   : > { %v4428_v13 = vpop.eup %4427  ;;  %4111 = vmatmul.mubr.msk.f32.vlgmr.msra.gmra.mxu1 %vm910_vm1, %v2203_v4  ;;  %vm2989_vm13 = vcmp.eq.s32.totalorder %v2979_v10, 1  ;;  %vm717_vm14 = vcmp.ne.s32.totalorder %v713_v8, 0 }
 0x4fb   : > { %2227 = vst.msk [vmem:[%s5512_s11 + $0x20] sm:$0xff] %vm910_vm1, %v2219_v20  ;;  %4114 = vmatpush3.msra.mxu1 %v5374_v43  ;;  %v2204_v19 = vmul.f32 %v4428_v13, %v5503_v31  ;;  %v2222_v58 = vadd.f32 %v2214_v12, %v2205_v48 }
 0x4fd   : > { %v2221_v14 = vadd.f32 %v2213_v6, %v2204_v19  ;;  %4115 = vmatprep.mubr.msk.f32.mxu1 %vm910_vm1, %v2204_v19  ;;  %2230 = vst.msk [vmem:[%s5512_s11 + $0x38] sm:$0xff] %vm910_vm1, %v2222_v58  ;;  %v2970_v6 = vsel %vm717_vm14, 1, %v4730_v15  ;;  %v714_v58 = vld [vmem:[%s5049_s18 + $0x3] sm:$0x1] }
 0x4fe   : > { %4116 = vmatmul.mubr.msk.f32.vlgmr.msra.gmra.mxu1 %vm910_vm1, %v2205_v48  ;;  %vm718_vm15 = vcmp.ne.s32.totalorder %v714_v58, 0 }
 0x4ff   : > { %2229 = vst.msk [vmem:[%s5512_s11 + $0x30] sm:$0xff] %vm910_vm1, %v2221_v14  ;;  %v2983_v14 = vrot.slane %v2970_v6, %v5469_v47 }
 0x501   : > { %vm2990_vm1 = vcmp.eq.s32.totalorder %v2983_v14, 1 }
 0x5b2   : > { %v5552_v27 = vpop.f32.mrf.mxu1 }
 0x5b4   : > { %v5554_v16 = vpop.f32.mrf.mxu1 }
 0x5b5   : > { %4150 = vmatprep.mubr.f32.mxu0 %v5554_v16 }
 0x5b6   : > { %v5557_v36 = vpop.f32.mrf.mxu1  ;;  %4151 = vmatmul.mubr.f32.vlgmr.msra.gmra.mxu0 %v5552_v27 }
 0x5b8   : > { %v5560_v43 = vpop.f32.mrf.mxu1 }
 0x5b9   : > { %4153 = vmatprep.mubr.f32.mxu0 %v5560_v43 }
 0x5ba   : > { %v5563_v17 = vpop.f32.mrf.mxu1  ;;  %4154 = vmatmul.mubr.f32.gmra.mxu0 %v5557_v36 }
 0x5bc   : > { %v5566_v18 = vpop.f32.mrf.mxu1 }
 0x5bd   : > { %4156 = vmatprep.mubr.f32.mxu0 %v5566_v18 }
 0x5be   : > { %v4117_v21 = vpop.f32.mrf.mxu1  ;;  %4157 = vmatmul.mubr.f32.gmra.mxu0 %v5563_v17 }
 0x5bf   : > { %4211 = vmatprep.subr.mxu0 %v4117_v21 }
 0x5c0   : > { %v2546_v22 = vpop.f32.mrf.mxu1  ;;  %4212 = vmatpush3.msra.mxu0 %v4117_v21 }
 0x5c1   : > { %4159 = vmatprep.mubr.f32.mxu0 %v2546_v22  ;;  %4213 = vmatprep.subr.mxu0 %v2546_v22 }
 0x5c2   : > { %4160 = vmatmul.mubr.f32.gmra.mxu0 %v4117_v21 }
 0x5c3   : > { %4214 = vmatpush3.msra.mxu0 %v2546_v22  ;;  %v2971_v22 = vsel %vm718_vm15, 1, %v4730_v15 }
 0x676   : > { %v4152_v25 = vpop.f32.mrf.mxu0 }
 0x677   : > { %v2627_v26 = vadd.f32 %v4152_v25, %v5438_v52 }
 0x678   : > { %v2621_v31 = vpop.f32.mrf.mxu0 }
 0x679   : > { %v2661_v28 = vmax.f32 %v2627_v26, 0.0  ;;  %v2622_v30 = vadd.f32 %v5438_v52, %v2621_v31  ;;  %v2987_v31 = vrot.slane %v2971_v22, %v5469_v47 }
 0x67a   : > { %v4155_v32 = vpop.f32.mrf.mxu0 }
 0x67b   : > { %v2660_v33 = vmax.f32 %v2622_v30, 0.0  ;;  %v2637_v34 = vadd.f32 %v4155_v32, %v5438_v52  ;;  %4162 = vmatprep.subr.mxu1 %v2661_v28  ;;  %vm2991_vm2 = vcmp.eq.s32.totalorder %v2987_v31, 1 }
 0x67c   : > { %v2631_v35 = vpop.f32.mrf.mxu0  ;;  %4163 = vmatpush3.xpose.msra.mxu1 %v2661_v28 }
 0x67d   : > { %4164 = vmatprep.subr.mxu1 %v2660_v33  ;;  %4166 = vmatprep.mubr.f32.mxu1 %v2660_v33  ;;  %v2632_v57 = vadd.f32 %v5438_v52, %v2631_v35  ;;  %v2663_v0 = vmax.f32 %v2637_v34, 0.0 }
 0x67e   : > { %v4158_v11 = vpop.f32.mrf.mxu0 }
 0x67f   : > { %v2662_v59 = vmax.f32 %v2632_v57, 0.0  ;;  %v2647_v46 = vadd.f32 %v4158_v11, %v5438_v52 }
 0x680   : > { %4165 = vmatpush3.xpose.msra.mxu1 %v2660_v33  ;;  %v2641_v41 = vpop.f32.mrf.mxu0 }
 0x681   : > { %4169 = vmatprep.subr.mxu1 %v2663_v0  ;;  %v2642_v24 = vadd.f32 %v5438_v52, %v2641_v41  ;;  %v2665_v45 = vmax.f32 %v2647_v46, 0.0 }
 0x682   : > { %v4161_v51 = vpop.f32.mrf.mxu0 }
 0x683   : > { %4167 = vmatmul.mubr.f32.vlgmr.msra.gmra.mxu1 %v2661_v28  ;;  %v2664_v53 = vmax.f32 %v2642_v24, 0.0  ;;  %v2657_v55 = vadd.f32 %v4161_v51, %v5438_v52 }
 0x684   : > { %4170 = vmatpush3.xpose.msra.mxu1 %v2663_v0  ;;  %4173 = vmatprep.mubr.f32.mxu1 %v2662_v59  ;;  %v2651_v9 = vpop.f32.mrf.mxu0 }
 0x685   : > { %4171 = vmatprep.subr.mxu1 %v2662_v59  ;;  %v2652_v1 = vadd.f32 %v5438_v52, %v2651_v9  ;;  %v2667_v60 = vmax.f32 %v2657_v55, 0.0  ;;  %v711_v52 = vld [vmem:[%s5049_s18] sm:$0x1]  ;;  %s3777_s18 = sld [smem:[#allocation2 + $0x1]] }
 0x686   : > { %vm715_vm10 = vcmp.ne.s32.totalorder %v711_v52, 0 }
 0x687   : > { %v2666_v54 = vmax.f32 %v2652_v1, 0.0  ;;  %v2968_v2 = vsel %vm715_vm10, 1, %v4730_v15 }
 0x688   : > { %4172 = vmatpush3.xpose.msra.mxu1 %v2662_v59  ;;  %v2975_v38 = vrot.slane %v2968_v2, %v5469_v47 }
 0x689   : > { %4176 = vmatprep.subr.mxu1 %v2665_v45 }
 0x68a   : > { %vm2988_vm12 = vcmp.eq.s32.totalorder %v2975_v38, 1 }
 0x68b   : > { %4174 = vmatmul.mubr.f32.vlgmr.msra.gmra.mxu1 %v2663_v0  ;;  %v5623_v31 = vstv %s3777_s18 }
 0x68c   : > { %4177 = vmatpush3.xpose.msra.mxu1 %v2665_v45  ;;  %4180 = vmatprep.mubr.f32.mxu1 %v2664_v53 }
 0x68d   : > { %4178 = vmatprep.subr.mxu1 %v2664_v53 }
 0x690   : > { %4179 = vmatpush3.xpose.msra.mxu1 %v2664_v53 }
 0x691   : > { %4183 = vmatprep.subr.mxu1 %v2667_v60 }
 0x693   : > { %4181 = vmatmul.mubr.f32.vlgmr.msra.gmra.mxu1 %v2665_v45 }
 0x694   : > { %4184 = vmatpush3.xpose.msra.mxu1 %v2667_v60  ;;  %4187 = vmatprep.mubr.f32.mxu1 %v2666_v54 }
 0x695   : > { %4185 = vmatprep.subr.mxu1 %v2666_v54 }
 0x698   : > { %4186 = vmatpush3.xpose.msra.mxu1 %v2666_v54 }
 0x699   : > { %4190 = vmatprep.subr.mxu1 %v5552_v27 }
 0x69b   : > { %4188 = vmatmul.mubr.f32.vlgmr.msra.gmra.mxu1 %v2667_v60 }
 0x69c   : > { %4191 = vmatpush3.msra.mxu1 %v5552_v27 }
 0x69d   : > { %4192 = vmatprep.subr.mxu1 %v5554_v16 }
 0x69e   : > { %4193 = vmatpush3.msra.mxu1 %v5554_v16 }
 0x69f   : > { %4197 = vmatprep.subr.mxu1 %v5557_v36 }
 0x743   : > { %v4168_v5 = vpop.f32.mrf.mxu1 }
 0x744   : > { %v2993_v63 = vsel %vm2988_vm12, -1e+30, %v4168_v5 }
 0x745   : > { %v2734_v3 = vpop.f32.mrf.mxu1  ;;  %v3003_v4 = vsel %vm721_vm0, %v2993_v63, -inf }
 0x746   : > { %v2992_v42 = vsel %vm2988_vm12, -1e+30, %v2734_v3  ;;  %3004 = vmax.xlane.f32.xlu1 %v3003_v4 }
 0x747   : > { %v3000_v40 = vsel %vm721_vm0, %v2992_v42, -inf }
 0x748   : > { %3001 = vmax.xlane.f32.xlu0 %v3000_v40 }
 0x74b   : > { %v4175_v39 = vpop.f32.mrf.mxu1 }
 0x74c   : > { %v2995_v12 = vsel %vm2989_vm13, -1e+30, %v4175_v39 }
 0x74d   : > { %v2809_v20 = vpop.f32.mrf.mxu1  ;;  %v3009_v48 = vsel %vm721_vm0, %v2995_v12, -inf }
 0x74e   : > { %v2994_v13 = vsel %vm2989_vm13, -1e+30, %v2809_v20  ;;  %3010 = vmax.xlane.f32.xlu1 %v3009_v48 }
 0x74f   : > { %v3006_v19 = vsel %vm721_vm0, %v2994_v13, -inf }
 0x750   : > { %3007 = vmax.xlane.f32.xlu0 %v3006_v19 }
 0x753   : > { %v4182_v27 = vpop.f32.mrf.mxu1 }
 0x754   : > { %v2997_v26 = vsel %vm2990_vm1, -1e+30, %v4182_v27 }
 0x755   : > { %v2884_v16 = vpop.f32.mrf.mxu1  ;;  %v3015_v30 = vsel %vm721_vm0, %v2997_v26, -inf }
 0x756   : > { %v2996_v21 = vsel %vm2990_vm1, -1e+30, %v2884_v16 }
 0x757   : > { %v3012_v25 = vsel %vm721_vm0, %v2996_v21, -inf }
 0x758   : > { %3013 = vmax.xlane.f32.xlu0 %v3012_v25 }
 0x75b   : > { %v4189_v28 = vpop.f32.mrf.mxu1 }
 0x75c   : > { %3016 = vmax.xlane.f32.xlu0 %v3015_v30  ;;  %v2999_v35 = vsel %vm2991_vm2, -1e+30, %v4189_v28  ;;  %v3090_v30 = vmul.f32 %v5427_v23, %v5623_v31 }
 0x75d   : > { %v2959_v32 = vpop.f32.mrf.mxu1  ;;  %v3021_v57 = vsel %vm721_vm0, %v2999_v35, -inf }
 0x75e   : > { %v2998_v33 = vsel %vm2991_vm2, -1e+30, %v2959_v32 }
 0x75f   : > { %v3018_v34 = vsel %vm721_vm0, %v2998_v33, -inf }
 0x760   : > { %3019 = vmax.xlane.f32.xlu1 %v3018_v34  ;;  %v5627_v34 = vld [vmem:[#allocation12 + $0x8] sm:$0xff] }
 0x764   : > { %3022 = vmax.xlane.f32.xlu1 %v3021_v57 }
 0x7cf   : > { %v3005_v15 = vpop.xlane.xlu1 %3004 }
 0x7d0   : > { %v3025_v0 = vsub.f32 %v2993_v63, %v3005_v15 }
 0x7d1   : > { %v3002_v11 = vpop.xlane.xlu0 %3001 }
 0x7d2   : > { %v3034_v59 = vmul.f32 1.442695, %v3025_v0  ;;  %v3024_v46 = vsub.f32 %v2992_v42, %v3002_v11  ;;  %v719_v11 = vld [vmem:[#allocation12] sm:$0xff] }
 0x7d4   : > { %4429 = vpow2.f32 %v3034_v59  ;;  %v3032_v47 = vmul.f32 1.442695, %v3024_v46 }
 0x7d6   : > { %4431 = vpow2.f32 %v3032_v47 }
 0x7d7   : > { %v3011_v41 = vpop.xlane.xlu1 %3010 }
 0x7d8   : > { %v3027_v24 = vsub.f32 %v2995_v12, %v3011_v41 }
 0x7d9   : > { %v3008_v45 = vpop.xlane.xlu0 %3007 }
 0x7da   : > { %v3038_v51 = vmul.f32 1.442695, %v3027_v24  ;;  %v3026_v53 = vsub.f32 %v2994_v13, %v3008_v45 }
 0x7dc   : > { %4433 = vpow2.f32 %v3038_v51  ;;  %v3036_v55 = vmul.f32 1.442695, %v3026_v53  ;;  %v3091_v51 = vmul.f32 %v5623_v31, %v5467_v56 }
 0x7de   : > { %4435 = vpow2.f32 %v3036_v55 }
 0x7e1   : > { %v4430_v9 = vpop.eup %4429  ;;  %v3014_v1 = vpop.xlane.xlu0 %3013 }
 0x7e2   : > { %v3028_v60 = vsub.f32 %v2996_v21, %v3014_v1  ;;  %v3051_v54 = vsel %vm721_vm0, %v4430_v9, 0.0 }
 0x7e3   : > { %v4432_v52 = vpop.eup %4431  ;;  %3052 = vadd.xlane.f32.xlu1 %v3051_v54 }
 0x7e4   : > { %v3040_v2 = vmul.f32 1.442695, %v3028_v60  ;;  %v3048_v61 = vsel %vm721_vm0, %v4432_v52, 0.0 }
 0x7e5   : > { %3049 = vadd.xlane.f32.xlu0 %v3048_v61  ;;  %v3017_v38 = vpop.xlane.xlu0 %3016  ;;  %v3094_v61 = vmul.f32 %v5431_v49, %v5623_v31 }
 0x7e6   : > { %4437 = vpow2.f32 %v3040_v2  ;;  %v3029_v62 = vsub.f32 %v2997_v26, %v3017_v38 }
 0x7e8   : > { %v3042_v5 = vmul.f32 1.442695, %v3029_v62 }
 0x7e9   : > { %v4434_v63 = vpop.eup %4433  ;;  %v3020_v3 = vpop.xlane.xlu1 %3019 }
 0x7ea   : > { %4439 = vpow2.f32 %v3042_v5  ;;  %v3030_v4 = vsub.f32 %v2998_v33, %v3020_v3  ;;  %v3057_v10 = vsel %vm721_vm0, %v4434_v63, 0.0  ;;  %v3095_v5 = vmul.f32 %v5623_v31, %v5478_v7 }
 0x7eb   : > { %v4436_v42 = vpop.eup %4435  ;;  %3058 = vadd.xlane.f32.xlu1 %v3057_v10 }
 0x7ec   : > { %v3044_v40 = vmul.f32 1.442695, %v3030_v4  ;;  %v3054_v8 = vsel %vm721_vm0, %v4436_v42, 0.0  ;;  %v3096_v4 = vmul.f32 %v5473_v44, %v5623_v31 }
 0x7ed   : > { %3055 = vadd.xlane.f32.xlu0 %v3054_v8  ;;  %v3023_v39 = vpop.xlane.xlu1 %3022 }
 0x7ee   : > { %4441 = vpow2.f32 %v3044_v40  ;;  %v3031_v12 = vsub.f32 %v2999_v35, %v3023_v39  ;;  %v3089_v35 = vmul.f32 %v5623_v31, %v5429_v29  ;;  %v3092_v29 = vmul.f32 %v5464_v37, %v5623_v31 }
 0x7f0   : > { %v3046_v20 = vmul.f32 1.442695, %v3031_v12 }
 0x7f2   : > { %4443 = vpow2.f32 %v3046_v20 }
 0x7f3   : > { %v5607_v48 = vpop.eup %4437 }
 0x7f4   : > { %v3060_v13 = vsel %vm721_vm0, %v5607_v48, 0.0 }
 0x7f5   : > { %3061 = vadd.xlane.f32.xlu0 %v3060_v13 }
 0x7f7   : > { %v5611_v6 = vpop.eup %4439 }
 0x7f8   : > { %v3063_v19 = vsel %vm721_vm0, %v5611_v6, 0.0 }
 0x7f9   : > { %3064 = vadd.xlane.f32.xlu0 %v3063_v19 }
 0x7fb   : > { %v5615_v58 = vpop.eup %4441 }
 0x7fc   : > { %v3066_v14 = vsel %vm721_vm0, %v5615_v58, 0.0 }
 0x7fd   : > { %3067 = vadd.xlane.f32.xlu1 %v3066_v14 }
 0x7ff   : > { %v5619_v27 = vpop.eup %4443 }
 0x800   : > { %v3069_v16 = vsel %vm721_vm0, %v5619_v27, 0.0 }
 0x801   : > { %3070 = vadd.xlane.f32.xlu1 %v3069_v16 }
 0x86c   : > { %v3053_v21 = vpop.xlane.xlu1 %3052 }
 0x86d   : > { %4445 = vrcp.f32 %v3053_v21 }
 0x86e   : > { %v3050_v22 = vpop.xlane.xlu0 %3049 }
 0x86f   : > { %4447 = vrcp.f32 %v3050_v22 }
 0x874   : > { %v3059_v25 = vpop.xlane.xlu1 %3058 }
 0x875   : > { %4449 = vrcp.f32 %v3059_v25 }
 0x876   : > { %v3056_v26 = vpop.xlane.xlu0 %3055 }
 0x877   : > { %4451 = vrcp.f32 %v3056_v26 }
 0x87a   : > { %v4446_v28 = vpop.eup %4445 }
 0x87b   : > { %v3081_v32 = vmul.f32 %v4446_v28, %v4430_v9 }
 0x87c   : > { %v4448_v33 = vpop.eup %4447 }
 0x87d   : > { %v3080_v57 = vmul.f32 %v4448_v33, %v4432_v52  ;;  %v3098_v15 = vadd.f32 %v3090_v30, %v3081_v32 }
 0x87e   : > { %v3062_v0 = vpop.xlane.xlu0 %3061 }
 0x87f   : > { %4453 = vrcp.f32 %v3062_v0  ;;  %v3097_v59 = vadd.f32 %v3089_v35, %v3080_v57  ;;  %v3106_v46 = vmul.f32 %v3098_v15, %v5627_v34 }
 0x881   : > { %v3105_v47 = vmul.f32 %v3097_v59, %v719_v11  ;;  %3114 = vst.msk [vmem:[%s5633_s14 + $0x8] sm:$0xff] %vm721_vm0, %v3106_v46 }
 0x882   : > { %v4450_v23 = vpop.eup %4449  ;;  %v3065_v41 = vpop.xlane.xlu0 %3064 }
 0x883   : > { %v3083_v24 = vmul.f32 %v4450_v23, %v4434_v63  ;;  %4455 = vrcp.f32 %v3065_v41  ;;  %3113 = vst.msk [vmem:[%s5633_s14] sm:$0xff] %vm721_vm0, %v3105_v47  ;;  %4194 = vmatprep.mubr.msk.f32.mxu1 %vm721_vm0, %v3105_v47 }
 0x884   : > { %v4452_v45 = vpop.eup %4451  ;;  %4195 = vmatmul.mubr.msk.f32.vlgmr.msra.gmra.mxu1 %vm721_vm0, %v3106_v46 }
 0x885   : > { %4198 = vmatpush3.msra.mxu1 %v5557_v36  ;;  %v3082_v53 = vmul.f32 %v4452_v45, %v4436_v42  ;;  %v3100_v55 = vadd.f32 %v3092_v29, %v3083_v24  ;;  %v3093_v36 = vmul.f32 %v5623_v31, %v5433_v50 }
 0x886   : > { %4199 = vmatprep.subr.mxu1 %v5560_v43  ;;  %v3068_v37 = vpop.xlane.xlu1 %3067 }
 0x887   : > { %4200 = vmatpush3.msra.mxu1 %v5560_v43  ;;  %4457 = vrcp.f32 %v3068_v37  ;;  %v3099_v9 = vadd.f32 %v3091_v51, %v3082_v53  ;;  %v3108_v1 = vmul.f32 %v3100_v55, %v5627_v34 }
 0x888   : > { %4204 = vmatprep.subr.mxu1 %v5563_v17 }
 0x889   : > { %v3107_v60 = vmul.f32 %v3099_v9, %v719_v11  ;;  %3116 = vst.msk [vmem:[%s5633_s14 + $0x18] sm:$0xff] %vm721_vm0, %v3108_v1 }
 0x88a   : > { %v3071_v54 = vpop.xlane.xlu1 %3070 }
 0x88b   : > { %4459 = vrcp.f32 %v3071_v54  ;;  %3115 = vst.msk [vmem:[%s5633_s14 + $0x10] sm:$0xff] %vm721_vm0, %v3107_v60  ;;  %4201 = vmatprep.mubr.msk.f32.mxu1 %vm721_vm0, %v3107_v60 }
 0x88c   : > { %v4454_v56 = vpop.eup %4453  ;;  %4202 = vmatmul.mubr.msk.f32.vlgmr.msra.gmra.mxu1 %vm721_vm0, %v3108_v1 }
 0x88d   : > { %4205 = vmatpush3.msra.mxu1 %v5563_v17  ;;  %v3084_v43 = vmul.f32 %v4454_v56, %v5607_v48 }
 0x88e   : > { %4206 = vmatprep.subr.mxu1 %v5566_v18 }
 0x88f   : > { %4207 = vmatpush3.msra.mxu1 %v5566_v18  ;;  %v3101_v52 = vadd.f32 %v3093_v36, %v3084_v43 }
 0x890   : > { %v4456_v2 = vpop.eup %4455 }
 0x891   : > { %v3085_v38 = vmul.f32 %v4456_v2, %v5611_v6  ;;  %v3109_v62 = vmul.f32 %v3101_v52, %v719_v11 }
 0x893   : > { %3117 = vst.msk [vmem:[%s5633_s14 + $0x20] sm:$0xff] %vm721_vm0, %v3109_v62  ;;  %4208 = vmatprep.mubr.msk.f32.mxu1 %vm721_vm0, %v3109_v62  ;;  %v3102_v50 = vadd.f32 %v3094_v61, %v3085_v38 }
 0x894   : > { %v4458_v17 = vpop.eup %4457 }
 0x895   : > { %v3110_v18 = vmul.f32 %v3102_v50, %v5627_v34  ;;  %v3086_v49 = vmul.f32 %v4458_v17, %v5615_v58 }
 0x897   : > { %3118 = vst.msk [vmem:[%s5633_s14 + $0x28] sm:$0xff] %vm721_vm0, %v3110_v18  ;;  %4209 = vmatmul.mubr.msk.f32.vlgmr.msra.gmra.mxu1 %vm721_vm0, %v3110_v18  ;;  %v3103_v63 = vadd.f32 %v3095_v5, %v3086_v49 }
 0x898   : > { %v4460_v3 = vpop.eup %4459 }
 0x899   : > { %v3087_v7 = vmul.f32 %v4460_v3, %v5619_v27  ;;  %v3111_v10 = vmul.f32 %v3103_v63, %v719_v11 }
 0x89b   : > { %v3104_v42 = vadd.f32 %v3096_v4, %v3087_v7  ;;  %3119 = vst.msk [vmem:[%s5633_s14 + $0x30] sm:$0xff] %vm721_vm0, %v3111_v10  ;;  %4215 = vmatprep.mubr.msk.f32.mxu0 %vm721_vm0, %v3111_v10 }
 0x89d   : > { %v3112_v40 = vmul.f32 %v3104_v42, %v5627_v34 }
 0x89f   : > { %3120 = vst.msk [vmem:[%s5633_s14 + $0x38] sm:$0xff] %vm721_vm0, %v3112_v40  ;;  %4216 = vmatmul.mubr.msk.f32.vlgmr.msra.gmra.mxu0 %vm721_vm0, %v3112_v40 }
 0x8a0   : > { %4625 = shalt.err (!%p4622_p11)
}
 0x8a1   : > { %s4626_s27 = scalar_lea.hbm %s5691_s26, 1024  ;;  %s4630_s17 = scalar_lea.hbm %s5853_s13, 2048 }
 0x8a2   : > { %p4627_p1 = scmp.ne.s32.totalorder %s5691_s26, %s4626_s27  ;;  %p4631_p12 = scmp.lt.s32.totalorder %s5691_s26, %s5853_s13 }
 0x8a3   : > { %p4632_p6 = scmp.lt.s32.totalorder %s4630_s17, %s4626_s27 }
 0x8a4   : > { %p4628_p5 = pnand %p4627_p1, %p5854_p7 }
 0x8a5   : > { %p4633_p2 = por %p4632_p6, %p4631_p12 }
 0x8a6   : > { %p4629_p4 = pneg %p4628_p5 }
 0x8a8   : > { %p4634_p0 = pnand %p4633_p2, %p4629_p4 }
 0x8aa   : > { %4637 = shalt.err (!%p4634_p0)
}
 0x8ab   : > { %s4732_s18 = smov 128   ;;  %s4733_s14 = smov 8  }
 0x8ac   : > { %4236 = dma.vmem_to_hbm [thread:$0]  (%p5854_p7), %s5694_s15, 1024, %s5691_s26, %s3460_s23, %s4732_s18, %s4732_s18, %s4733_s14  }
 0x8ad   : > { %s623_s21 = scalar_lea.vmem [#allocation14], %s5056_s16  ;;  %s5855_s15 = sld [smem:[#allocation34_spill]] }
 0x8ae   : > { %s3500_s19 = sshll.u32 %s623_s21, 4  ;;  %s3465_s20 = scalar_lea.sflag [#allocation15], %s5038_s3  ;;  %s5723_s19 = int_to_ptr.vmem [resolvable:$true] %s3500_s19 }
 0x8af   : > { %s4638_s0 = scalar_lea.vmem %s5723_s19, 1024  ;;  %s4734_s4 = smov [#allocation14]  }
 0x8b0   : > { %p4639_p3 = scmp.ne.s32.totalorder %s5723_s19, %s4638_s0  ;;  %s4642_s10 = sshll.u32 %s4734_s4, 4  ;;  %s4643_s10 = int_to_ptr.vmem [resolvable:$false] %s4642_s10 }
 0x8b1   : > { %s4644_s27 = scalar_lea.vmem %s4643_s10, 2048  ;;  %p4645_p10 = scmp.lt.s32.totalorder %s5723_s19, %s4643_s10 }
 0x8b2   : > { %p4640_p8 = pnand %p4639_p3, %p5854_p7  ;;  %p4646_p13 = scmp.lt.s32.totalorder %s4644_s27, %s4638_s0 }
 0x8b3   : > { %s5730_s23 = scalar_lea.hbm %s5855_s15, %s3829_s30 }
 0x8b4   : > { %p4641_p9 = pneg %p4640_p8  ;;  %p4647_p11 = por %p4646_p13, %p4645_p10 }
 0x8b6   : > { %p4648_p1 = pnand %p4647_p11, %p4641_p9 }
 0x944   : > { %v4196_v44 = vpop.f32.mrf.mxu1 }
 0x945   : > { %3446 = vst [vmem:[%s623_s21 + $0x8] sm:$0xff] %v4196_v44 }
 0x946   : > { %v3193_v8 = vpop.f32.mrf.mxu1 }
 0x947   : > { %3445 = vst [vmem:[%s623_s21] sm:$0xff] %v3193_v8 }
 0x94c   : > { %v4203_v39 = vpop.f32.mrf.mxu1 }
 0x94d   : > { %3448 = vst [vmem:[%s623_s21 + $0x18] sm:$0xff] %v4203_v39 }
 0x94e   : > { %v3274_v12 = vpop.f32.mrf.mxu1 }
 0x94f   : > { %3447 = vst [vmem:[%s623_s21 + $0x10] sm:$0xff] %v3274_v12 }
 0x957   : > { %v4210_v20 = vpop.f32.mrf.mxu1 }
 0x958   : > { %3450 = vst [vmem:[%s623_s21 + $0x28] sm:$0xff] %v4210_v20 }
 0x959   : > { %v3355_v48 = vpop.f32.mrf.mxu1 }
 0x95a   : > { %3449 = vst [vmem:[%s623_s21 + $0x20] sm:$0xff] %v3355_v48 }
 0x95f   : > { %v4217_v13 = vpop.f32.mrf.mxu0 }
 0x960   : > { %3452 = vst [vmem:[%s623_s21 + $0x38] sm:$0xff] %v4217_v13 }
 0x961   : > { %v3436_v6 = vpop.f32.mrf.mxu0 }
 0x962   : > { %3451 = vst [vmem:[%s623_s21 + $0x30] sm:$0xff] %v3436_v6 }
 0x963   : > { %4651 = shalt.err (!%p4648_p1)
}
 0x964   : > { %s4652_s25 = scalar_lea.hbm %s5730_s23, 1024  ;;  %s4656_s12 = scalar_lea.hbm %s5855_s15, 2048 }
 0x965   : > { %p4653_p5 = scmp.ne.s32.totalorder %s5730_s23, %s4652_s25  ;;  %p4657_p6 = scmp.lt.s32.totalorder %s5730_s23, %s5855_s15 }
 0x966   : > { %p4658_p2 = scmp.lt.s32.totalorder %s4656_s12, %s4652_s25 }
 0x967   : > { %p4654_p4 = pnand %p4653_p5, %p5854_p7 }
 0x968   : > { %p4659_p0 = por %p4658_p2, %p4657_p6 }
 0x969   : > { %p4655_p12 = pneg %p4654_p4 }
 0x96b   : > { %p4660_p3 = pnand %p4659_p0, %p4655_p12 }
 0x96d   : > { %4663 = shalt.err (!%p4660_p3)
}
 0x96e   : > { %4237 = dma.vmem_to_hbm [thread:$0]  (%p5854_p7), %s5723_s19, 1024, %s5730_s23, %s3465_s20, %s4732_s18, %s4732_s18, %s4733_s14  }
 0x96f PF: > { %s5856_s28 = sld [smem:[#allocation22_spill]]  ;;  %p5859_p9 = scmp.ge.s32.totalorder %s4718_s24, 2 }
 0x970   : > { %s5857_s11 = sld [smem:[#allocation27_spill]] }
 0x975   : > { %s3524_s21 = sand.u32 1, %s5856_s28  }
 0x976   : > { %p5858_p8 = scmp.ne.s32.totalorder %s5857_s11, 0  ;;  %s3525_s16 = scalar_lea.sflag [#allocation4], %s3524_s21 }
 0x978   : > { %p4261_p10 = pnand %p5859_p9, %p5858_p8 }
 0x97a   : > { %p4262_p13 = pneg %p4261_p10 }
 0x97c   : > { %4697 = dma.done.wait (%p4262_p13), %s3525_s16, 1024  }
 0x97d   : > { %4699 = vsyncadd (%p4262_p13), %s3525_s16, 4294966272  ;;  %s3534_s26 = scalar_lea.sflag [#allocation15], %s3524_s21 }
 0x97e   : > { %4701 = dma.done.wait (%p4262_p13), %s3534_s26, 1024  }
 0x97f   : > { %4703 = vsyncadd (%p4262_p13), %s3534_s26, 4294966272  ;;  %s5860_s24 = sld [smem:[#allocation24_spill]]  ;;  %s5863_s21 = smov %s4710_s22 }
 0x980   : > { %s5861_s7 = sld [smem:[#allocation23_spill]] }
 0x981   : > { %s5862_s23 = sld [smem:[#allocation25_spill]] }
 0x985   : > { %p34_p7 = scmp.ge.s32.totalorder %s5860_s24, 4  }
 0x986   : > { %s5864_s22 = smov %s5861_s7 }
 0x987   :  { %36 = sbr.rel (!%p34_p7) target bundleno = 19 (0x13), region = 180 }
 0x98c   :  { %3539 = vsyncpa [#allocation3], 1 }
 0x98d   :  { %3541 = vsyncpa [#allocation3 + $0x1], 1 }
 0x98e   :  { %3542 = vsyncpa [#allocation8], 1 }
 0x98f   :  { %3544 = vsyncpa [#allocation8 + $0x1], 1 }
 0x990   :  { %3545 = vsyncpa [#allocation11], 1 }
 0x991   :  { %3546 = vsyncpa [#allocation4], 1 }
 0x992   :  { %3548 = vsyncpa [#allocation4 + $0x1], 1 }
 0x993   :  { %3549 = vsyncpa [#allocation15], 1 }
 0x994   :  { %3551 = vsyncpa [#allocation15 + $0x1], 1 }
 0x995   :  { %3552 = vsyncpa [#allocation5], 1 }
 0x996   :  { %3554 = vsyncpa [#allocation5 + $0x1], 1 }

</bundles_post_ra>
